<compile_context>
chip_gen: v6e
topology: v6e:2x2x1
jax: 0.10.0
libtpu: 0.0.40
codegen_flags: <defaults>
</compile_context>

<pallas_src>
import functools
import math
import numpy as np
import jax
import jax.numpy as jnp
from jax import lax
from jax.experimental import pallas as pl
from jax.experimental.pallas import tpu as pltpu


def _largest_divisor_at_most(n, target):
    t = min(n, target)
    while n % t:
        t -= 1
    return t


def encoder_layer_kernel(x_ref, wqkv_ref, bqkv_ref, wo_ref, bo_ref,
                         w1_ref, b1_ref, w2_ref, b2_ref,
                         g1_ref, be1_ref, g2_ref, be2_ref,
                         o_ref, h_sc, *, nhead, kv_chunk, ffn_tile):
    x_in = x_ref[0]                                   # (S, D) in storage dtype
    S, D = x_in.shape
    hd = D // nhead
    n_kv = S // kv_chunk

    # ---- QKV in-projection (wqkv pre-transposed (D,3D); q-scale folded by wrapper) ----
    qkv = jnp.dot(x_in, wqkv_ref[...], preferred_element_type=jnp.float32)
    qkv = qkv + bqkv_ref[...].astype(jnp.float32)     # (S, 3D) f32 accumulate
    qkv_lo = qkv.astype(x_in.dtype)                   # MXU-input dtype (no-op for f32)

    # ---- per-head attention: flash-style online softmax over KV chunks;
    #      head outputs stored into lane slices of the VMEM scratch (no concat).
    for h in range(nhead):
        qh = qkv_lo[:, h * hd:(h + 1) * hd]
        kh = qkv_lo[:, D + h * hd:D + (h + 1) * hd]
        vh = qkv_lo[:, 2 * D + h * hd:2 * D + (h + 1) * hd]

        def scores(c):
            kc = kh[c * kv_chunk:(c + 1) * kv_chunk]
            return lax.dot_general(qh, kc, (((1,), (1,)), ((), ())),
                                   preferred_element_type=jnp.float32)

        s = scores(0)                                 # (S, kv_chunk) f32
        m = jnp.max(s, axis=-1, keepdims=True)
        p = jnp.exp(s - m)
        l = jnp.sum(p, axis=-1, keepdims=True)
        acc = jnp.dot(p.astype(x_in.dtype), vh[:kv_chunk],
                      preferred_element_type=jnp.float32)
        for c in range(1, n_kv):
            s = scores(c)
            m_new = jnp.maximum(m, jnp.max(s, axis=-1, keepdims=True))
            alpha = jnp.exp(m - m_new)
            p = jnp.exp(s - m_new)
            l = alpha * l + jnp.sum(p, axis=-1, keepdims=True)
            acc = alpha * acc + jnp.dot(p.astype(x_in.dtype),
                                        vh[c * kv_chunk:(c + 1) * kv_chunk],
                                        preferred_element_type=jnp.float32)
            m = m_new
        h_sc[:, h * hd:(h + 1) * hd] = acc * pl.reciprocal(l, approx=True)

    # ---- out-projection (wo pre-transposed) + residual + LayerNorm1 ----
    attn = jnp.dot(h_sc[...].astype(wo_ref.dtype), wo_ref[...],
                   preferred_element_type=jnp.float32) + bo_ref[...].astype(jnp.float32)
    h1 = x_in.astype(jnp.float32) + attn
    mu = jnp.mean(h1, axis=-1, keepdims=True)
    var = jnp.mean((h1 - mu) ** 2, axis=-1, keepdims=True)
    h1 = (h1 - mu) * lax.rsqrt(var + 1e-5) * g1_ref[...] + be1_ref[...]
    h_sc[...] = h1                                    # reuse scratch: now holds norm1(x+attn)

    # ---- FFN + residual + LayerNorm2, tiled over S (ReLU intermediate is (tile, F)) ----
    b1 = b1_ref[...].astype(jnp.float32)
    b2 = b2_ref[...].astype(jnp.float32)
    g2 = g2_ref[...]
    be2 = be2_ref[...]
    n_ffn = S // ffn_tile

    def ffn_body(i, carry):
        row0 = pl.multiple_of(i * ffn_tile, ffn_tile)
        h1c = h_sc[pl.ds(row0, ffn_tile), :]                                  # (tile, D) f32
        f = jnp.dot(h1c.astype(w1_ref.dtype), w1_ref[...],
                    preferred_element_type=jnp.float32) + b1
        f = jnp.maximum(f, 0.0)                                               # ReLU
        f = jnp.dot(f.astype(w2_ref.dtype), w2_ref[...],
                    preferred_element_type=jnp.float32) + b2
        h2 = h1c + f
        mu2 = jnp.mean(h2, axis=-1, keepdims=True)
        var2 = jnp.mean((h2 - mu2) ** 2, axis=-1, keepdims=True)
        h2 = (h2 - mu2) * lax.rsqrt(var2 + 1e-5) * g2 + be2
        o_ref[0, pl.ds(row0, ffn_tile), :] = h2.astype(o_ref.dtype)
        return carry

    lax.fori_loop(0, n_ffn, ffn_body, 0, unroll=True)


def _prep_params(params, nhead, compute_dtype):
    """One-time weight prep: transpose for direct MXU consumption, fold q scale."""
    D = params['wo'].shape[0]
    hd = D // nhead
    scale = 1.0 / math.sqrt(hd)
    col_scale = jnp.concatenate([jnp.full((D,), scale, jnp.float32),
                                 jnp.ones((2 * D,), jnp.float32)])
    wqkv_t = params['wqkv'].T * col_scale[None, :]    # (D, 3D), q columns pre-scaled
    bqkv = params['bqkv'] * col_scale[None, :]        # (1, 3D)
    wo_t = params['wo'].T                             # (D, D)
    w1_t = params['w1'].T                             # (D, F)
    w2_t = params['w2'].T                             # (F, D)
    if compute_dtype is not None:
        wqkv_t = wqkv_t.astype(compute_dtype)
        wo_t = wo_t.astype(compute_dtype)
        w1_t = w1_t.astype(compute_dtype)
        w2_t = w2_t.astype(compute_dtype)
    return (wqkv_t, bqkv, wo_t, params['bo'], w1_t, params['b1'], w2_t, params['b2'],
            params['g1'], params['be1'], params['g2'], params['be2'])


def _encoder_call(x, weight_args, nhead, kv_chunk, ffn_tile, single_buffer_weights):
    B, S, D = x.shape

    def w_spec(arr):
        # All weights/biases here are 2-D and constant across the batch grid.
        if single_buffer_weights:
            return pl.BlockSpec(arr.shape, lambda b: (0, 0), pipeline_mode=pl.Buffered(1))
        return pl.BlockSpec(arr.shape, lambda b: (0, 0))

    kernel = functools.partial(encoder_layer_kernel, nhead=nhead,
                               kv_chunk=kv_chunk, ffn_tile=ffn_tile)

    # Explicit scoped-VMEM budget: 2x (activation blocks + weights) + scratch + margin,
    # clamped to stay within every generation's physical VMEM (v7x: 64 MiB/TC).
    weight_bytes = sum(int(np.prod(a.shape)) * a.dtype.itemsize for a in weight_args)
    est = 2 * (2 * S * D * x.dtype.itemsize + weight_bytes) + S * D * 4 + (4 << 20)
    vmem_limit = int(min(max(est, 32 << 20), 64 << 20))

    return pl.pallas_call(
        kernel,
        out_shape=jax.ShapeDtypeStruct((B, S, D), x.dtype),
        grid=(B,),
        in_specs=[pl.BlockSpec((1, S, D), lambda b: (b, 0, 0))]
                 + [w_spec(a) for a in weight_args],
        out_specs=pl.BlockSpec((1, S, D), lambda b: (b, 0, 0)),
        scratch_shapes=[pltpu.VMEM((S, D), jnp.float32)],
        compiler_params=pltpu.CompilerParams(
            dimension_semantics=("parallel",),          # batch grid -> both v7x TCs when B >= 2
            vmem_limit_bytes=vmem_limit),
    )(x, *weight_args)


_WEIGHT_SINGLE_BUFFER = None   # probed once: does this jax/mosaic accept pl.Buffered(1)?


def transformer_encoder_layer(src, params, nhead, *, compute_dtype=None):
    """src: (S, B, D) as in PyTorch.  Returns (S, B, D).

    compute_dtype: optional MXU-input dtype (e.g. jnp.bfloat16 for v6e/v7x production);
    None keeps the incoming f32.  Accumulation / softmax / LayerNorm stats are f32.
    """
    S, B, D = src.shape
    assert D % nhead == 0, "d_model must be divisible by nhead"
    # TODO(synk): keep activations in (B, S, D) in the surrounding model to avoid these
    # two HBM round-trip transposes (kept here to match the PyTorch (S, B, D) contract).
    x = jnp.transpose(src, (1, 0, 2))
    if compute_dtype is not None:
        x = x.astype(compute_dtype)
    weight_args = _prep_params(params, nhead, compute_dtype)
    kv_chunk = _largest_divisor_at_most(S, 512)     # flash-style KV blocking for large S
    ffn_tile = _largest_divisor_at_most(S, 256)     # S-tiling of the FFN / LN2 epilogue

    global _WEIGHT_SINGLE_BUFFER
    if _WEIGHT_SINGLE_BUFFER is None:
        try:
            out = _encoder_call(x, weight_args, nhead, kv_chunk, ffn_tile, True)
            out = jax.block_until_ready(out)
            _WEIGHT_SINGLE_BUFFER = True
        except Exception:
            # pl.Buffered(1) not supported by this runtime: fall back to default buffering.
            _WEIGHT_SINGLE_BUFFER = False
            out = _encoder_call(x, weight_args, nhead, kv_chunk, ffn_tile, False)
    else:
        out = _encoder_call(x, weight_args, nhead, kv_chunk, ffn_tile,
                            _WEIGHT_SINGLE_BUFFER)
    return jnp.transpose(out, (1, 0, 2))


def reference_forward(src, params, nhead):
    """Pure-JAX f32 reference of the same forward (PyTorch semantics)."""
    S, B, D = src.shape
    hd = D // nhead
    x = jnp.transpose(src, (1, 0, 2)).astype(jnp.float32)        # (B, S, D)
    qkv = jnp.einsum('bsd,ed->bse', x, params['wqkv']) + params['bqkv'][0]
    q = qkv[..., :D] / np.sqrt(hd)
    k = qkv[..., D:2 * D]
    v = qkv[..., 2 * D:]
    q = q.reshape(B, S, nhead, hd).transpose(0, 2, 1, 3)
    k = k.reshape(B, S, nhead, hd).transpose(0, 2, 1, 3)
    v = v.reshape(B, S, nhead, hd).transpose(0, 2, 1, 3)
    p = jax.nn.softmax(jnp.einsum('bhqd,bhkd->bhqk', q, k), axis=-1)
    a = jnp.einsum('bhqk,bhkd->bhqd', p, v).transpose(0, 2, 1, 3).reshape(B, S, D)
    a = jnp.einsum('bsd,ed->bse', a, params['wo']) + params['bo'][0]

    def ln(h, g, b):
        mu = jnp.mean(h, -1, keepdims=True)
        var = jnp.mean((h - mu) ** 2, -1, keepdims=True)
        return (h - mu) * lax.rsqrt(var + 1e-5) * g[0] + b[0]

    h1 = ln(x + a, params['g1'], params['be1'])
    f = jnp.maximum(jnp.einsum('bsd,fd->bsf', h1, params['w1']) + params['b1'][0], 0.0)
    f = jnp.einsum('bsf,df->bsd', f, params['w2']) + params['b2'][0]
    h2 = ln(h1 + f, params['g2'], params['be2'])
    return jnp.transpose(h2, (1, 0, 2))


def init_params(key, d_model, nhead, dim_feedforward):
    ks = jax.random.split(key, 8)
    s = 0.05
    return {
        'wqkv': s * jax.random.normal(ks[0], (3 * d_model, d_model), jnp.float32),
        'bqkv': s * jax.random.normal(ks[1], (1, 3 * d_model), jnp.float32),
        'wo':   s * jax.random.normal(ks[2], (d_model, d_model), jnp.float32),
        'bo':   s * jax.random.normal(ks[3], (1, d_model), jnp.float32),
        'w1':   s * jax.random.normal(ks[4], (dim_feedforward, d_model), jnp.float32),
        'b1':   s * jax.random.normal(ks[5], (1, dim_feedforward), jnp.float32),
        'w2':   s * jax.random.normal(ks[6], (d_model, dim_feedforward), jnp.float32),
        'b2':   s * jax.random.normal(ks[7], (1, d_model), jnp.float32),
        'g1':   jnp.ones((1, d_model), jnp.float32),
        'be1':  jnp.zeros((1, d_model), jnp.float32),
        'g2':   jnp.ones((1, d_model), jnp.float32),
        'be2':  jnp.zeros((1, d_model), jnp.float32),
    }


if __name__ == "__main__":
    S, B, D = 8, 2, 32
    nhead = 4
    dim_feedforward = 64

    key = jax.random.PRNGKey(0)
    k_x, k_p = jax.random.split(key)
    src = jax.random.normal(k_x, (S, B, D), jnp.float32)
    params = init_params(k_p, D, nhead, dim_feedforward)

    out = jax.block_until_ready(transformer_encoder_layer(src, params, nhead))
    ref = jax.block_until_ready(reference_forward(src, params, nhead))
    assert out.shape == (S, B, D)
    # 2e-3 tolerance accounts for the approximate EUP reciprocal in the softmax.
    np.testing.assert_allclose(np.asarray(out), np.asarray(ref), rtol=2e-3, atol=2e-3)

    # bf16 MXU-input path (production setting for v6e/v7x): loose sanity check only.
    out_bf16 = jax.block_until_ready(
        transformer_encoder_layer(src, params, nhead, compute_dtype=jnp.bfloat16))
    np.testing.assert_allclose(np.asarray(out_bf16.astype(jnp.float32)), np.asarray(ref),
                               rtol=1e-1, atol=1e-1)

    print("KERNEL_OK")
</pallas_src>

<mosaic_0001>
module attributes {stable_mosaic.version = 11 : i64} {
  func.func @encoder_layer_kernel(%arg0: i32, %arg1: memref<1x8x32xf32, #tpu.memory_space<vmem>>, %arg2: memref<32x96xf32, #tpu.memory_space<vmem>>, %arg3: memref<1x96xf32, #tpu.memory_space<vmem>>, %arg4: memref<32x32xf32, #tpu.memory_space<vmem>>, %arg5: memref<1x32xf32, #tpu.memory_space<vmem>>, %arg6: memref<32x64xf32, #tpu.memory_space<vmem>>, %arg7: memref<1x64xf32, #tpu.memory_space<vmem>>, %arg8: memref<64x32xf32, #tpu.memory_space<vmem>>, %arg9: memref<1x32xf32, #tpu.memory_space<vmem>>, %arg10: memref<1x32xf32, #tpu.memory_space<vmem>>, %arg11: memref<1x32xf32, #tpu.memory_space<vmem>>, %arg12: memref<1x32xf32, #tpu.memory_space<vmem>>, %arg13: memref<1x32xf32, #tpu.memory_space<vmem>>, %arg14: memref<1x8x32xf32, #tpu.memory_space<vmem>>, %arg15: memref<8x32xf32, #tpu.memory_space<vmem>>) attributes {dimension_semantics = [#tpu.dimension_semantics<parallel>], iteration_bounds = array<i64: 2>, scalar_prefetch = 0 : i64, scratch_operands = 1 : i64, tpu.core_type = #tpu.core_type<tc>, window_params = [{transform_indices = @transform_0, window_bounds = array<i64: 1, 8, 32>}, {pipeline_mode = #tpu.pipeline_mode<synchronous>, transform_indices = @transform_1, window_bounds = array<i64: 32, 96>}, {pipeline_mode = #tpu.pipeline_mode<synchronous>, transform_indices = @transform_2, window_bounds = array<i64: 1, 96>}, {pipeline_mode = #tpu.pipeline_mode<synchronous>, transform_indices = @transform_3, window_bounds = array<i64: 32, 32>}, {pipeline_mode = #tpu.pipeline_mode<synchronous>, transform_indices = @transform_4, window_bounds = array<i64: 1, 32>}, {pipeline_mode = #tpu.pipeline_mode<synchronous>, transform_indices = @transform_5, window_bounds = array<i64: 32, 64>}, {pipeline_mode = #tpu.pipeline_mode<synchronous>, transform_indices = @transform_6, window_bounds = array<i64: 1, 64>}, {pipeline_mode = #tpu.pipeline_mode<synchronous>, transform_indices = @transform_7, window_bounds = array<i64: 64, 32>}, {pipeline_mode = #tpu.pipeline_mode<synchronous>, transform_indices = @transform_8, window_bounds = array<i64: 1, 32>}, {pipeline_mode = #tpu.pipeline_mode<synchronous>, transform_indices = @transform_9, window_bounds = array<i64: 1, 32>}, {pipeline_mode = #tpu.pipeline_mode<synchronous>, transform_indices = @transform_10, window_bounds = array<i64: 1, 32>}, {pipeline_mode = #tpu.pipeline_mode<synchronous>, transform_indices = @transform_11, window_bounds = array<i64: 1, 32>}, {pipeline_mode = #tpu.pipeline_mode<synchronous>, transform_indices = @transform_12, window_bounds = array<i64: 1, 32>}, {transform_indices = @transform_13, window_bounds = array<i64: 1, 8, 32>}]} {
    %c0 = arith.constant 0 : index
    %c0_0 = arith.constant 0 : index
    %c0_1 = arith.constant 0 : index
    %0 = vector.load %arg1[%c0, %c0_0, %c0_1] : memref<1x8x32xf32, #tpu.memory_space<vmem>>, vector<1x8x32xf32>
    %1 = vector.shape_cast %0 : vector<1x8x32xf32> to vector<8x32xf32>
    %c0_2 = arith.constant 0 : index
    %c0_3 = arith.constant 0 : index
    %2 = vector.load %arg2[%c0_2, %c0_3] : memref<32x96xf32, #tpu.memory_space<vmem>>, vector<32x96xf32>
    %cst = arith.constant dense<0.000000e+00> : vector<8x96xf32>
    %3 = tpu.matmul %1, %2, %cst {dimension_numbers = #tpu.dot_dimension_numbers<[1], [0], [0], [1], [0, 0, 1, 1], [], []>} : vector<8x32xf32>, vector<32x96xf32>, vector<8x96xf32> -> vector<8x96xf32>
    %c0_4 = arith.constant 0 : index
    %c0_5 = arith.constant 0 : index
    %4 = vector.load %arg3[%c0_4, %c0_5] : memref<1x96xf32, #tpu.memory_space<vmem>>, vector<1x96xf32>
    %5 = vector.broadcast %4 : vector<1x96xf32> to vector<8x96xf32>
    %6 = arith.addf %3, %5 : vector<8x96xf32>
    %7 = vector.extract_strided_slice %6 {offsets = [0, 0], sizes = [8, 8], strides = [1, 1]} : vector<8x96xf32> to vector<8x8xf32>
    %8 = vector.extract_strided_slice %6 {offsets = [0, 32], sizes = [8, 8], strides = [1, 1]} : vector<8x96xf32> to vector<8x8xf32>
    %9 = vector.extract_strided_slice %6 {offsets = [0, 64], sizes = [8, 8], strides = [1, 1]} : vector<8x96xf32> to vector<8x8xf32>
    %cst_6 = arith.constant dense<0.000000e+00> : vector<8x8xf32>
    %10 = tpu.matmul %7, %8, %cst_6 {dimension_numbers = #tpu.dot_dimension_numbers<[1], [1], [0], [0], [0, 0, 1, 0], [], []>} : vector<8x8xf32>, vector<8x8xf32>, vector<8x8xf32> -> vector<8x8xf32>
    %cst_7 = arith.constant dense<0xFF800000> : vector<8xf32>
    %11 = vector.multi_reduction <maximumf>, %10, %cst_7 [1] : vector<8x8xf32> to vector<8xf32>
    %12 = vector.shape_cast %11 : vector<8xf32> to vector<8x1xf32>
    %13 = vector.broadcast %12 : vector<8x1xf32> to vector<8x8xf32>
    %14 = arith.subf %10, %13 : vector<8x8xf32>
    %15 = math.exp %14 : vector<8x8xf32>
    %cst_8 = arith.constant dense<0.000000e+00> : vector<8xf32>
    %16 = vector.multi_reduction <add>, %15, %cst_8 [1] : vector<8x8xf32> to vector<8xf32>
    %17 = vector.shape_cast %16 : vector<8xf32> to vector<8x1xf32>
    %cst_9 = arith.constant dense<0.000000e+00> : vector<8x8xf32>
    %18 = tpu.matmul %15, %9, %cst_9 {dimension_numbers = #tpu.dot_dimension_numbers<[1], [0], [0], [1], [0, 0, 1, 1], [], []>} : vector<8x8xf32>, vector<8x8xf32>, vector<8x8xf32> -> vector<8x8xf32>
    %19 = tpu.reciprocal %17 {approx = true} : vector<8x1xf32> -> vector<8x1xf32>
    %20 = vector.broadcast %19 : vector<8x1xf32> to vector<8x8xf32>
    %21 = arith.mulf %18, %20 : vector<8x8xf32>
    %c0_10 = arith.constant 0 : index
    %c0_11 = arith.constant 0 : index
    %22 = vector.load %arg15[%c0_10, %c0_11] : memref<8x32xf32, #tpu.memory_space<vmem>>, vector<8x8xf32>
    tpu.vector_store %arg15[%c0_10, %c0_11], %21 {strides = array<i32>} : memref<8x32xf32, #tpu.memory_space<vmem>>, vector<8x8xf32>,
    %23 = vector.extract_strided_slice %6 {offsets = [0, 8], sizes = [8, 8], strides = [1, 1]} : vector<8x96xf32> to vector<8x8xf32>
    %24 = vector.extract_strided_slice %6 {offsets = [0, 40], sizes = [8, 8], strides = [1, 1]} : vector<8x96xf32> to vector<8x8xf32>
    %25 = vector.extract_strided_slice %6 {offsets = [0, 72], sizes = [8, 8], strides = [1, 1]} : vector<8x96xf32> to vector<8x8xf32>
    %cst_12 = arith.constant dense<0.000000e+00> : vector<8x8xf32>
    %26 = tpu.matmul %23, %24, %cst_12 {dimension_numbers = #tpu.dot_dimension_numbers<[1], [1], [0], [0], [0, 0, 1, 0], [], []>} : vector<8x8xf32>, vector<8x8xf32>, vector<8x8xf32> -> vector<8x8xf32>
    %cst_13 = arith.constant dense<0xFF800000> : vector<8xf32>
    %27 = vector.multi_reduction <maximumf>, %26, %cst_13 [1] : vector<8x8xf32> to vector<8xf32>
    %28 = vector.shape_cast %27 : vector<8xf32> to vector<8x1xf32>
    %29 = vector.broadcast %28 : vector<8x1xf32> to vector<8x8xf32>
    %30 = arith.subf %26, %29 : vector<8x8xf32>
    %31 = math.exp %30 : vector<8x8xf32>
    %cst_14 = arith.constant dense<0.000000e+00> : vector<8xf32>
    %32 = vector.multi_reduction <add>, %31, %cst_14 [1] : vector<8x8xf32> to vector<8xf32>
    %33 = vector.shape_cast %32 : vector<8xf32> to vector<8x1xf32>
    %cst_15 = arith.constant dense<0.000000e+00> : vector<8x8xf32>
    %34 = tpu.matmul %31, %25, %cst_15 {dimension_numbers = #tpu.dot_dimension_numbers<[1], [0], [0], [1], [0, 0, 1, 1], [], []>} : vector<8x8xf32>, vector<8x8xf32>, vector<8x8xf32> -> vector<8x8xf32>
    %35 = tpu.reciprocal %33 {approx = true} : vector<8x1xf32> -> vector<8x1xf32>
    %36 = vector.broadcast %35 : vector<8x1xf32> to vector<8x8xf32>
    %37 = arith.mulf %34, %36 : vector<8x8xf32>
    %c0_16 = arith.constant 0 : index
    %c8 = arith.constant 8 : index
    %38 = vector.load %arg15[%c0_16, %c8] : memref<8x32xf32, #tpu.memory_space<vmem>>, vector<8x8xf32>
    tpu.vector_store %arg15[%c0_16, %c8], %37 {strides = array<i32>} : memref<8x32xf32, #tpu.memory_space<vmem>>, vector<8x8xf32>,
    %39 = vector.extract_strided_slice %6 {offsets = [0, 16], sizes = [8, 8], strides = [1, 1]} : vector<8x96xf32> to vector<8x8xf32>
    %40 = vector.extract_strided_slice %6 {offsets = [0, 48], sizes = [8, 8], strides = [1, 1]} : vector<8x96xf32> to vector<8x8xf32>
    %41 = vector.extract_strided_slice %6 {offsets = [0, 80], sizes = [8, 8], strides = [1, 1]} : vector<8x96xf32> to vector<8x8xf32>
    %cst_17 = arith.constant dense<0.000000e+00> : vector<8x8xf32>
    %42 = tpu.matmul %39, %40, %cst_17 {dimension_numbers = #tpu.dot_dimension_numbers<[1], [1], [0], [0], [0, 0, 1, 0], [], []>} : vector<8x8xf32>, vector<8x8xf32>, vector<8x8xf32> -> vector<8x8xf32>
    %cst_18 = arith.constant dense<0xFF800000> : vector<8xf32>
    %43 = vector.multi_reduction <maximumf>, %42, %cst_18 [1] : vector<8x8xf32> to vector<8xf32>
    %44 = vector.shape_cast %43 : vector<8xf32> to vector<8x1xf32>
    %45 = vector.broadcast %44 : vector<8x1xf32> to vector<8x8xf32>
    %46 = arith.subf %42, %45 : vector<8x8xf32>
    %47 = math.exp %46 : vector<8x8xf32>
    %cst_19 = arith.constant dense<0.000000e+00> : vector<8xf32>
    %48 = vector.multi_reduction <add>, %47, %cst_19 [1] : vector<8x8xf32> to vector<8xf32>
    %49 = vector.shape_cast %48 : vector<8xf32> to vector<8x1xf32>
    %cst_20 = arith.constant dense<0.000000e+00> : vector<8x8xf32>
    %50 = tpu.matmul %47, %41, %cst_20 {dimension_numbers = #tpu.dot_dimension_numbers<[1], [0], [0], [1], [0, 0, 1, 1], [], []>} : vector<8x8xf32>, vector<8x8xf32>, vector<8x8xf32> -> vector<8x8xf32>
    %51 = tpu.reciprocal %49 {approx = true} : vector<8x1xf32> -> vector<8x1xf32>
    %52 = vector.broadcast %51 : vector<8x1xf32> to vector<8x8xf32>
    %53 = arith.mulf %50, %52 : vector<8x8xf32>
    %c0_21 = arith.constant 0 : index
    %c16 = arith.constant 16 : index
    %54 = vector.load %arg15[%c0_21, %c16] : memref<8x32xf32, #tpu.memory_space<vmem>>, vector<8x8xf32>
    tpu.vector_store %arg15[%c0_21, %c16], %53 {strides = array<i32>} : memref<8x32xf32, #tpu.memory_space<vmem>>, vector<8x8xf32>,
    %55 = vector.extract_strided_slice %6 {offsets = [0, 24], sizes = [8, 8], strides = [1, 1]} : vector<8x96xf32> to vector<8x8xf32>
    %56 = vector.extract_strided_slice %6 {offsets = [0, 56], sizes = [8, 8], strides = [1, 1]} : vector<8x96xf32> to vector<8x8xf32>
    %57 = vector.extract_strided_slice %6 {offsets = [0, 88], sizes = [8, 8], strides = [1, 1]} : vector<8x96xf32> to vector<8x8xf32>
    %cst_22 = arith.constant dense<0.000000e+00> : vector<8x8xf32>
    %58 = tpu.matmul %55, %56, %cst_22 {dimension_numbers = #tpu.dot_dimension_numbers<[1], [1], [0], [0], [0, 0, 1, 0], [], []>} : vector<8x8xf32>, vector<8x8xf32>, vector<8x8xf32> -> vector<8x8xf32>
    %cst_23 = arith.constant dense<0xFF800000> : vector<8xf32>
    %59 = vector.multi_reduction <maximumf>, %58, %cst_23 [1] : vector<8x8xf32> to vector<8xf32>
    %60 = vector.shape_cast %59 : vector<8xf32> to vector<8x1xf32>
    %61 = vector.broadcast %60 : vector<8x1xf32> to vector<8x8xf32>
    %62 = arith.subf %58, %61 : vector<8x8xf32>
    %63 = math.exp %62 : vector<8x8xf32>
    %cst_24 = arith.constant dense<0.000000e+00> : vector<8xf32>
    %64 = vector.multi_reduction <add>, %63, %cst_24 [1] : vector<8x8xf32> to vector<8xf32>
    %65 = vector.shape_cast %64 : vector<8xf32> to vector<8x1xf32>
    %cst_25 = arith.constant dense<0.000000e+00> : vector<8x8xf32>
    %66 = tpu.matmul %63, %57, %cst_25 {dimension_numbers = #tpu.dot_dimension_numbers<[1], [0], [0], [1], [0, 0, 1, 1], [], []>} : vector<8x8xf32>, vector<8x8xf32>, vector<8x8xf32> -> vector<8x8xf32>
    %67 = tpu.reciprocal %65 {approx = true} : vector<8x1xf32> -> vector<8x1xf32>
    %68 = vector.broadcast %67 : vector<8x1xf32> to vector<8x8xf32>
    %69 = arith.mulf %66, %68 : vector<8x8xf32>
    %c0_26 = arith.constant 0 : index
    %c24 = arith.constant 24 : index
    %70 = vector.load %arg15[%c0_26, %c24] : memref<8x32xf32, #tpu.memory_space<vmem>>, vector<8x8xf32>
    tpu.vector_store %arg15[%c0_26, %c24], %69 {strides = array<i32>} : memref<8x32xf32, #tpu.memory_space<vmem>>, vector<8x8xf32>,
    %c0_27 = arith.constant 0 : index
    %c0_28 = arith.constant 0 : index
    %71 = vector.load %arg15[%c0_27, %c0_28] : memref<8x32xf32, #tpu.memory_space<vmem>>, vector<8x32xf32>
    %c0_29 = arith.constant 0 : index
    %c0_30 = arith.constant 0 : index
    %72 = vector.load %arg4[%c0_29, %c0_30] : memref<32x32xf32, #tpu.memory_space<vmem>>, vector<32x32xf32>
    %cst_31 = arith.constant dense<0.000000e+00> : vector<8x32xf32>
    %73 = tpu.matmul %71, %72, %cst_31 {dimension_numbers = #tpu.dot_dimension_numbers<[1], [0], [0], [1], [0, 0, 1, 1], [], []>} : vector<8x32xf32>, vector<32x32xf32>, vector<8x32xf32> -> vector<8x32xf32>
    %c0_32 = arith.constant 0 : index
    %c0_33 = arith.constant 0 : index
    %74 = vector.load %arg5[%c0_32, %c0_33] : memref<1x32xf32, #tpu.memory_space<vmem>>, vector<1x32xf32>
    %75 = vector.broadcast %74 : vector<1x32xf32> to vector<8x32xf32>
    %76 = arith.addf %73, %75 : vector<8x32xf32>
    %77 = arith.addf %1, %76 : vector<8x32xf32>
    %cst_34 = arith.constant dense<0.000000e+00> : vector<8xf32>
    %78 = vector.multi_reduction <add>, %77, %cst_34 [1] : vector<8x32xf32> to vector<8xf32>
    %79 = vector.shape_cast %78 : vector<8xf32> to vector<8x1xf32>
    %cst_35 = arith.constant 3.200000e+01 : f32
    %80 = vector.broadcast %cst_35 : f32 to vector<8x1xf32>
    %81 = arith.divf %79, %80 : vector<8x1xf32>
    %82 = vector.broadcast %81 : vector<8x1xf32> to vector<8x32xf32>
    %83 = arith.subf %77, %82 : vector<8x32xf32>
    %84 = arith.mulf %83, %83 : vector<8x32xf32>
    %cst_36 = arith.constant dense<0.000000e+00> : vector<8xf32>
    %85 = vector.multi_reduction <add>, %84, %cst_36 [1] : vector<8x32xf32> to vector<8xf32>
    %86 = vector.shape_cast %85 : vector<8xf32> to vector<8x1xf32>
    %cst_37 = arith.constant 3.200000e+01 : f32
    %87 = vector.broadcast %cst_37 : f32 to vector<8x1xf32>
    %88 = arith.divf %86, %87 : vector<8x1xf32>
    %89 = vector.broadcast %81 : vector<8x1xf32> to vector<8x32xf32>
    %90 = arith.subf %77, %89 : vector<8x32xf32>
    %cst_38 = arith.constant 9.99999974E-6 : f32
    %91 = vector.broadcast %cst_38 : f32 to vector<8x1xf32>
    %92 = arith.addf %88, %91 : vector<8x1xf32>
    %93 = math.rsqrt %92 : vector<8x1xf32>
    %94 = vector.broadcast %93 : vector<8x1xf32> to vector<8x32xf32>
    %95 = arith.mulf %90, %94 : vector<8x32xf32>
    %c0_39 = arith.constant 0 : index
    %c0_40 = arith.constant 0 : index
    %96 = vector.load %arg10[%c0_39, %c0_40] : memref<1x32xf32, #tpu.memory_space<vmem>>, vector<1x32xf32>
    %97 = vector.broadcast %96 : vector<1x32xf32> to vector<8x32xf32>
    %98 = arith.mulf %95, %97 : vector<8x32xf32>
    %c0_41 = arith.constant 0 : index
    %c0_42 = arith.constant 0 : index
    %99 = vector.load %arg11[%c0_41, %c0_42] : memref<1x32xf32, #tpu.memory_space<vmem>>, vector<1x32xf32>
    %100 = vector.broadcast %99 : vector<1x32xf32> to vector<8x32xf32>
    %101 = arith.addf %98, %100 : vector<8x32xf32>
    %c0_43 = arith.constant 0 : index
    %c0_44 = arith.constant 0 : index
    %102 = vector.load %arg15[%c0_43, %c0_44] : memref<8x32xf32, #tpu.memory_space<vmem>>, vector<8x32xf32>
    tpu.vector_store %arg15[%c0_43, %c0_44], %101 {strides = array<i32>} : memref<8x32xf32, #tpu.memory_space<vmem>>, vector<8x32xf32>,
    %c0_45 = arith.constant 0 : index
    %c0_46 = arith.constant 0 : index
    %103 = vector.load %arg7[%c0_45, %c0_46] : memref<1x64xf32, #tpu.memory_space<vmem>>, vector<1x64xf32>
    %c0_47 = arith.constant 0 : index
    %c0_48 = arith.constant 0 : index
    %104 = vector.load %arg9[%c0_47, %c0_48] : memref<1x32xf32, #tpu.memory_space<vmem>>, vector<1x32xf32>
    %c0_49 = arith.constant 0 : index
    %c0_50 = arith.constant 0 : index
    %105 = vector.load %arg12[%c0_49, %c0_50] : memref<1x32xf32, #tpu.memory_space<vmem>>, vector<1x32xf32>
    %c0_51 = arith.constant 0 : index
    %c0_52 = arith.constant 0 : index
    %106 = vector.load %arg13[%c0_51, %c0_52] : memref<1x32xf32, #tpu.memory_space<vmem>>, vector<1x32xf32>
    %c0_i32 = arith.constant 0 : i32
    %c8_i32 = arith.constant 8 : i32
    %107 = arith.muli %c0_i32, %c8_i32 : i32
    %108 = tpu.assume_multiple %107, 8 : i32
    %109 = arith.index_cast %108 : i32 to index
    %c0_53 = arith.constant 0 : index
    %110 = vector.load %arg15[%109, %c0_53] : memref<8x32xf32, #tpu.memory_space<vmem>>, vector<8x32xf32>
    %c0_54 = arith.constant 0 : index
    %c0_55 = arith.constant 0 : index
    %111 = vector.load %arg6[%c0_54, %c0_55] : memref<32x64xf32, #tpu.memory_space<vmem>>, vector<32x64xf32>
    %cst_56 = arith.constant dense<0.000000e+00> : vector<8x64xf32>
    %112 = tpu.matmul %110, %111, %cst_56 {dimension_numbers = #tpu.dot_dimension_numbers<[1], [0], [0], [1], [0, 0, 1, 1], [], []>} : vector<8x32xf32>, vector<32x64xf32>, vector<8x64xf32> -> vector<8x64xf32>
    %113 = vector.broadcast %103 : vector<1x64xf32> to vector<8x64xf32>
    %114 = arith.addf %112, %113 : vector<8x64xf32>
    %cst_57 = arith.constant 0.000000e+00 : f32
    %115 = vector.broadcast %cst_57 : f32 to vector<8x64xf32>
    %116 = arith.maximumf %114, %115 : vector<8x64xf32>
    %c0_58 = arith.constant 0 : index
    %c0_59 = arith.constant 0 : index
    %117 = vector.load %arg8[%c0_58, %c0_59] : memref<64x32xf32, #tpu.memory_space<vmem>>, vector<64x32xf32>
    %cst_60 = arith.constant dense<0.000000e+00> : vector<8x32xf32>
    %118 = tpu.matmul %116, %117, %cst_60 {dimension_numbers = #tpu.dot_dimension_numbers<[1], [0], [0], [1], [0, 0, 1, 1], [], []>} : vector<8x64xf32>, vector<64x32xf32>, vector<8x32xf32> -> vector<8x32xf32>
    %119 = vector.broadcast %104 : vector<1x32xf32> to vector<8x32xf32>
    %120 = arith.addf %118, %119 : vector<8x32xf32>
    %121 = arith.addf %110, %120 : vector<8x32xf32>
    %cst_61 = arith.constant dense<0.000000e+00> : vector<8xf32>
    %122 = vector.multi_reduction <add>, %121, %cst_61 [1] : vector<8x32xf32> to vector<8xf32>
    %123 = vector.shape_cast %122 : vector<8xf32> to vector<8x1xf32>
    %cst_62 = arith.constant 3.200000e+01 : f32
    %124 = vector.broadcast %cst_62 : f32 to vector<8x1xf32>
    %125 = arith.divf %123, %124 : vector<8x1xf32>
    %126 = vector.broadcast %125 : vector<8x1xf32> to vector<8x32xf32>
    %127 = arith.subf %121, %126 : vector<8x32xf32>
    %128 = arith.mulf %127, %127 : vector<8x32xf32>
    %cst_63 = arith.constant dense<0.000000e+00> : vector<8xf32>
    %129 = vector.multi_reduction <add>, %128, %cst_63 [1] : vector<8x32xf32> to vector<8xf32>
    %130 = vector.shape_cast %129 : vector<8xf32> to vector<8x1xf32>
    %cst_64 = arith.constant 3.200000e+01 : f32
    %131 = vector.broadcast %cst_64 : f32 to vector<8x1xf32>
    %132 = arith.divf %130, %131 : vector<8x1xf32>
    %133 = vector.broadcast %125 : vector<8x1xf32> to vector<8x32xf32>
    %134 = arith.subf %121, %133 : vector<8x32xf32>
    %cst_65 = arith.constant 9.99999974E-6 : f32
    %135 = vector.broadcast %cst_65 : f32 to vector<8x1xf32>
    %136 = arith.addf %132, %135 : vector<8x1xf32>
    %137 = math.rsqrt %136 : vector<8x1xf32>
    %138 = vector.broadcast %137 : vector<8x1xf32> to vector<8x32xf32>
    %139 = arith.mulf %134, %138 : vector<8x32xf32>
    %140 = vector.broadcast %105 : vector<1x32xf32> to vector<8x32xf32>
    %141 = arith.mulf %139, %140 : vector<8x32xf32>
    %142 = vector.broadcast %106 : vector<1x32xf32> to vector<8x32xf32>
    %143 = arith.addf %141, %142 : vector<8x32xf32>
    %c0_66 = arith.constant 0 : index
    %144 = arith.index_cast %108 : i32 to index
    %c0_67 = arith.constant 0 : index
    %145 = vector.load %arg14[%c0_66, %144, %c0_67] : memref<1x8x32xf32, #tpu.memory_space<vmem>>, vector<1x8x32xf32>
    %146 = vector.shape_cast %145 : vector<1x8x32xf32> to vector<8x32xf32>
    %147 = vector.shape_cast %143 : vector<8x32xf32> to vector<1x8x32xf32>
    tpu.vector_store %arg14[%c0_66, %144, %c0_67], %147 {strides = array<i32>} : memref<1x8x32xf32, #tpu.memory_space<vmem>>, vector<1x8x32xf32>,
    %c1_i32 = arith.constant 1 : i32
    return
  }
  func.func @transform_0(%arg0: i32) -> (i32, i32, i32) {
    %c0_i32 = arith.constant 0 : i32
    %c0_i32_0 = arith.constant 0 : i32
    %c0_i32_1 = arith.constant 0 : i32
    return %arg0, %c0_i32, %c0_i32_0 : i32, i32, i32
  }
  func.func @transform_1(%arg0: i32) -> (i32, i32) {
    %c0_i32 = arith.constant 0 : i32
    %c0_i32_0 = arith.constant 0 : i32
    %c0_i32_1 = arith.constant 0 : i32
    return %c0_i32, %c0_i32_0 : i32, i32
  }
  func.func @transform_2(%arg0: i32) -> (i32, i32) {
    %c0_i32 = arith.constant 0 : i32
    %c0_i32_0 = arith.constant 0 : i32
    %c0_i32_1 = arith.constant 0 : i32
    return %c0_i32, %c0_i32_0 : i32, i32
  }
  func.func @transform_3(%arg0: i32) -> (i32, i32) {
    %c0_i32 = arith.constant 0 : i32
    %c0_i32_0 = arith.constant 0 : i32
    %c0_i32_1 = arith.constant 0 : i32
    return %c0_i32, %c0_i32_0 : i32, i32
  }
  func.func @transform_4(%arg0: i32) -> (i32, i32) {
    %c0_i32 = arith.constant 0 : i32
    %c0_i32_0 = arith.constant 0 : i32
    %c0_i32_1 = arith.constant 0 : i32
    return %c0_i32, %c0_i32_0 : i32, i32
  }
  func.func @transform_5(%arg0: i32) -> (i32, i32) {
    %c0_i32 = arith.constant 0 : i32
    %c0_i32_0 = arith.constant 0 : i32
    %c0_i32_1 = arith.constant 0 : i32
    return %c0_i32, %c0_i32_0 : i32, i32
  }
  func.func @transform_6(%arg0: i32) -> (i32, i32) {
    %c0_i32 = arith.constant 0 : i32
    %c0_i32_0 = arith.constant 0 : i32
    %c0_i32_1 = arith.constant 0 : i32
    return %c0_i32, %c0_i32_0 : i32, i32
  }
  func.func @transform_7(%arg0: i32) -> (i32, i32) {
    %c0_i32 = arith.constant 0 : i32
    %c0_i32_0 = arith.constant 0 : i32
    %c0_i32_1 = arith.constant 0 : i32
    return %c0_i32, %c0_i32_0 : i32, i32
  }
  func.func @transform_8(%arg0: i32) -> (i32, i32) {
    %c0_i32 = arith.constant 0 : i32
    %c0_i32_0 = arith.constant 0 : i32
    %c0_i32_1 = arith.constant 0 : i32
    return %c0_i32, %c0_i32_0 : i32, i32
  }
  func.func @transform_9(%arg0: i32) -> (i32, i32) {
    %c0_i32 = arith.constant 0 : i32
    %c0_i32_0 = arith.constant 0 : i32
    %c0_i32_1 = arith.constant 0 : i32
    return %c0_i32, %c0_i32_0 : i32, i32
  }
  func.func @transform_10(%arg0: i32) -> (i32, i32) {
    %c0_i32 = arith.constant 0 : i32
    %c0_i32_0 = arith.constant 0 : i32
    %c0_i32_1 = arith.constant 0 : i32
    return %c0_i32, %c0_i32_0 : i32, i32
  }
  func.func @transform_11(%arg0: i32) -> (i32, i32) {
    %c0_i32 = arith.constant 0 : i32
    %c0_i32_0 = arith.constant 0 : i32
    %c0_i32_1 = arith.constant 0 : i32
    return %c0_i32, %c0_i32_0 : i32, i32
  }
  func.func @transform_12(%arg0: i32) -> (i32, i32) {
    %c0_i32 = arith.constant 0 : i32
    %c0_i32_0 = arith.constant 0 : i32
    %c0_i32_1 = arith.constant 0 : i32
    return %c0_i32, %c0_i32_0 : i32, i32
  }
  func.func @transform_13(%arg0: i32) -> (i32, i32, i32) {
    %c0_i32 = arith.constant 0 : i32
    %c0_i32_0 = arith.constant 0 : i32
    %c0_i32_1 = arith.constant 0 : i32
    return %arg0, %c0_i32, %c0_i32_0 : i32, i32, i32
  }
}

module attributes {stable_mosaic.version = 11 : i64} {
  func.func @encoder_layer_kernel(%arg0: i32, %arg1: memref<1x8x32xf32, #tpu.memory_space<vmem>>, %arg2: memref<32x96xf32, #tpu.memory_space<vmem>>, %arg3: memref<1x96xf32, #tpu.memory_space<vmem>>, %arg4: memref<32x32xf32, #tpu.memory_space<vmem>>, %arg5: memref<1x32xf32, #tpu.memory_space<vmem>>, %arg6: memref<32x64xf32, #tpu.memory_space<vmem>>, %arg7: memref<1x64xf32, #tpu.memory_space<vmem>>, %arg8: memref<64x32xf32, #tpu.memory_space<vmem>>, %arg9: memref<1x32xf32, #tpu.memory_space<vmem>>, %arg10: memref<1x32xf32, #tpu.memory_space<vmem>>, %arg11: memref<1x32xf32, #tpu.memory_space<vmem>>, %arg12: memref<1x32xf32, #tpu.memory_space<vmem>>, %arg13: memref<1x32xf32, #tpu.memory_space<vmem>>, %arg14: memref<1x8x32xf32, #tpu.memory_space<vmem>>, %arg15: memref<8x32xf32, #tpu.memory_space<vmem>>) attributes {dimension_semantics = [#tpu.dimension_semantics<parallel>], iteration_bounds = array<i64: 2>, scalar_prefetch = 0 : i64, scratch_operands = 1 : i64, tpu.core_type = #tpu.core_type<tc>, window_params = [{transform_indices = @transform_0, window_bounds = array<i64: 1, 8, 32>}, {pipeline_mode = #tpu.pipeline_mode<synchronous>, transform_indices = @transform_1, window_bounds = array<i64: 32, 96>}, {pipeline_mode = #tpu.pipeline_mode<synchronous>, transform_indices = @transform_2, window_bounds = array<i64: 1, 96>}, {pipeline_mode = #tpu.pipeline_mode<synchronous>, transform_indices = @transform_3, window_bounds = array<i64: 32, 32>}, {pipeline_mode = #tpu.pipeline_mode<synchronous>, transform_indices = @transform_4, window_bounds = array<i64: 1, 32>}, {pipeline_mode = #tpu.pipeline_mode<synchronous>, transform_indices = @transform_5, window_bounds = array<i64: 32, 64>}, {pipeline_mode = #tpu.pipeline_mode<synchronous>, transform_indices = @transform_6, window_bounds = array<i64: 1, 64>}, {pipeline_mode = #tpu.pipeline_mode<synchronous>, transform_indices = @transform_7, window_bounds = array<i64: 64, 32>}, {pipeline_mode = #tpu.pipeline_mode<synchronous>, transform_indices = @transform_8, window_bounds = array<i64: 1, 32>}, {pipeline_mode = #tpu.pipeline_mode<synchronous>, transform_indices = @transform_9, window_bounds = array<i64: 1, 32>}, {pipeline_mode = #tpu.pipeline_mode<synchronous>, transform_indices = @transform_10, window_bounds = array<i64: 1, 32>}, {pipeline_mode = #tpu.pipeline_mode<synchronous>, transform_indices = @transform_11, window_bounds = array<i64: 1, 32>}, {pipeline_mode = #tpu.pipeline_mode<synchronous>, transform_indices = @transform_12, window_bounds = array<i64: 1, 32>}, {transform_indices = @transform_13, window_bounds = array<i64: 1, 8, 32>}]} {
    %c0 = arith.constant 0 : index
    %c0_0 = arith.constant 0 : index
    %c0_1 = arith.constant 0 : index
    %0 = vector.load %arg1[%c0, %c0_0, %c0_1] : memref<1x8x32xf32, #tpu.memory_space<vmem>>, vector<1x8x32xf32>
    %1 = vector.shape_cast %0 : vector<1x8x32xf32> to vector<8x32xf32>
    %c0_2 = arith.constant 0 : index
    %c0_3 = arith.constant 0 : index
    %2 = vector.load %arg2[%c0_2, %c0_3] : memref<32x96xf32, #tpu.memory_space<vmem>>, vector<32x96xf32>
    %cst = arith.constant dense<0.000000e+00> : vector<8x96xf32>
    %3 = tpu.matmul %1, %2, %cst {dimension_numbers = #tpu.dot_dimension_numbers<[1], [0], [0], [1], [0, 0, 1, 1], [], []>} : vector<8x32xf32>, vector<32x96xf32>, vector<8x96xf32> -> vector<8x96xf32>
    %c0_4 = arith.constant 0 : index
    %c0_5 = arith.constant 0 : index
    %4 = vector.load %arg3[%c0_4, %c0_5] : memref<1x96xf32, #tpu.memory_space<vmem>>, vector<1x96xf32>
    %5 = vector.broadcast %4 : vector<1x96xf32> to vector<8x96xf32>
    %6 = arith.addf %3, %5 : vector<8x96xf32>
    %7 = vector.extract_strided_slice %6 {offsets = [0, 0], sizes = [8, 8], strides = [1, 1]} : vector<8x96xf32> to vector<8x8xf32>
    %8 = vector.extract_strided_slice %6 {offsets = [0, 32], sizes = [8, 8], strides = [1, 1]} : vector<8x96xf32> to vector<8x8xf32>
    %9 = vector.extract_strided_slice %6 {offsets = [0, 64], sizes = [8, 8], strides = [1, 1]} : vector<8x96xf32> to vector<8x8xf32>
    %cst_6 = arith.constant dense<0.000000e+00> : vector<8x8xf32>
    %10 = tpu.matmul %7, %8, %cst_6 {dimension_numbers = #tpu.dot_dimension_numbers<[1], [1], [0], [0], [0, 0, 1, 0], [], []>} : vector<8x8xf32>, vector<8x8xf32>, vector<8x8xf32> -> vector<8x8xf32>
    %cst_7 = arith.constant dense<0xFF800000> : vector<8xf32>
    %11 = vector.multi_reduction <maximumf>, %10, %cst_7 [1] : vector<8x8xf32> to vector<8xf32>
    %12 = vector.shape_cast %11 : vector<8xf32> to vector<8x1xf32>
    %13 = vector.broadcast %12 : vector<8x1xf32> to vector<8x8xf32>
    %14 = arith.subf %10, %13 : vector<8x8xf32>
    %15 = math.exp %14 : vector<8x8xf32>
    %cst_8 = arith.constant dense<0.000000e+00> : vector<8xf32>
    %16 = vector.multi_reduction <add>, %15, %cst_8 [1] : vector<8x8xf32> to vector<8xf32>
    %17 = vector.shape_cast %16 : vector<8xf32> to vector<8x1xf32>
    %cst_9 = arith.constant dense<0.000000e+00> : vector<8x8xf32>
    %18 = tpu.matmul %15, %9, %cst_9 {dimension_numbers = #tpu.dot_dimension_numbers<[1], [0], [0], [1], [0, 0, 1, 1], [], []>} : vector<8x8xf32>, vector<8x8xf32>, vector<8x8xf32> -> vector<8x8xf32>
    %19 = tpu.reciprocal %17 {approx = true} : vector<8x1xf32> -> vector<8x1xf32>
    %20 = vector.broadcast %19 : vector<8x1xf32> to vector<8x8xf32>
    %21 = arith.mulf %18, %20 : vector<8x8xf32>
    %c0_10 = arith.constant 0 : index
    %c0_11 = arith.constant 0 : index
    %22 = vector.load %arg15[%c0_10, %c0_11] : memref<8x32xf32, #tpu.memory_space<vmem>>, vector<8x8xf32>
    tpu.vector_store %arg15[%c0_10, %c0_11], %21 {strides = array<i32>} : memref<8x32xf32, #tpu.memory_space<vmem>>, vector<8x8xf32>,
    %23 = vector.extract_strided_slice %6 {offsets = [0, 8], sizes = [8, 8], strides = [1, 1]} : vector<8x96xf32> to vector<8x8xf32>
    %24 = vector.extract_strided_slice %6 {offsets = [0, 40], sizes = [8, 8], strides = [1, 1]} : vector<8x96xf32> to vector<8x8xf32>
    %25 = vector.extract_strided_slice %6 {offsets = [0, 72], sizes = [8, 8], strides = [1, 1]} : vector<8x96xf32> to vector<8x8xf32>
    %cst_12 = arith.constant dense<0.000000e+00> : vector<8x8xf32>
    %26 = tpu.matmul %23, %24, %cst_12 {dimension_numbers = #tpu.dot_dimension_numbers<[1], [1], [0], [0], [0, 0, 1, 0], [], []>} : vector<8x8xf32>, vector<8x8xf32>, vector<8x8xf32> -> vector<8x8xf32>
    %cst_13 = arith.constant dense<0xFF800000> : vector<8xf32>
    %27 = vector.multi_reduction <maximumf>, %26, %cst_13 [1] : vector<8x8xf32> to vector<8xf32>
    %28 = vector.shape_cast %27 : vector<8xf32> to vector<8x1xf32>
    %29 = vector.broadcast %28 : vector<8x1xf32> to vector<8x8xf32>
    %30 = arith.subf %26, %29 : vector<8x8xf32>
    %31 = math.exp %30 : vector<8x8xf32>
    %cst_14 = arith.constant dense<0.000000e+00> : vector<8xf32>
    %32 = vector.multi_reduction <add>, %31, %cst_14 [1] : vector<8x8xf32> to vector<8xf32>
    %33 = vector.shape_cast %32 : vector<8xf32> to vector<8x1xf32>
    %cst_15 = arith.constant dense<0.000000e+00> : vector<8x8xf32>
    %34 = tpu.matmul %31, %25, %cst_15 {dimension_numbers = #tpu.dot_dimension_numbers<[1], [0], [0], [1], [0, 0, 1, 1], [], []>} : vector<8x8xf32>, vector<8x8xf32>, vector<8x8xf32> -> vector<8x8xf32>
    %35 = tpu.reciprocal %33 {approx = true} : vector<8x1xf32> -> vector<8x1xf32>
    %36 = vector.broadcast %35 : vector<8x1xf32> to vector<8x8xf32>
    %37 = arith.mulf %34, %36 : vector<8x8xf32>
    %c0_16 = arith.constant 0 : index
    %c8 = arith.constant 8 : index
    %38 = vector.load %arg15[%c0_16, %c8] : memref<8x32xf32, #tpu.memory_space<vmem>>, vector<8x8xf32>
    tpu.vector_store %arg15[%c0_16, %c8], %37 {strides = array<i32>} : memref<8x32xf32, #tpu.memory_space<vmem>>, vector<8x8xf32>,
    %39 = vector.extract_strided_slice %6 {offsets = [0, 16], sizes = [8, 8], strides = [1, 1]} : vector<8x96xf32> to vector<8x8xf32>
    %40 = vector.extract_strided_slice %6 {offsets = [0, 48], sizes = [8, 8], strides = [1, 1]} : vector<8x96xf32> to vector<8x8xf32>
    %41 = vector.extract_strided_slice %6 {offsets = [0, 80], sizes = [8, 8], strides = [1, 1]} : vector<8x96xf32> to vector<8x8xf32>
    %cst_17 = arith.constant dense<0.000000e+00> : vector<8x8xf32>
    %42 = tpu.matmul %39, %40, %cst_17 {dimension_numbers = #tpu.dot_dimension_numbers<[1], [1], [0], [0], [0, 0, 1, 0], [], []>} : vector<8x8xf32>, vector<8x8xf32>, vector<8x8xf32> -> vector<8x8xf32>
    %cst_18 = arith.constant dense<0xFF800000> : vector<8xf32>
    %43 = vector.multi_reduction <maximumf>, %42, %cst_18 [1] : vector<8x8xf32> to vector<8xf32>
    %44 = vector.shape_cast %43 : vector<8xf32> to vector<8x1xf32>
    %45 = vector.broadcast %44 : vector<8x1xf32> to vector<8x8xf32>
    %46 = arith.subf %42, %45 : vector<8x8xf32>
    %47 = math.exp %46 : vector<8x8xf32>
    %cst_19 = arith.constant dense<0.000000e+00> : vector<8xf32>
    %48 = vector.multi_reduction <add>, %47, %cst_19 [1] : vector<8x8xf32> to vector<8xf32>
    %49 = vector.shape_cast %48 : vector<8xf32> to vector<8x1xf32>
    %cst_20 = arith.constant dense<0.000000e+00> : vector<8x8xf32>
    %50 = tpu.matmul %47, %41, %cst_20 {dimension_numbers = #tpu.dot_dimension_numbers<[1], [0], [0], [1], [0, 0, 1, 1], [], []>} : vector<8x8xf32>, vector<8x8xf32>, vector<8x8xf32> -> vector<8x8xf32>
    %51 = tpu.reciprocal %49 {approx = true} : vector<8x1xf32> -> vector<8x1xf32>
    %52 = vector.broadcast %51 : vector<8x1xf32> to vector<8x8xf32>
    %53 = arith.mulf %50, %52 : vector<8x8xf32>
    %c0_21 = arith.constant 0 : index
    %c16 = arith.constant 16 : index
    %54 = vector.load %arg15[%c0_21, %c16] : memref<8x32xf32, #tpu.memory_space<vmem>>, vector<8x8xf32>
    tpu.vector_store %arg15[%c0_21, %c16], %53 {strides = array<i32>} : memref<8x32xf32, #tpu.memory_space<vmem>>, vector<8x8xf32>,
    %55 = vector.extract_strided_slice %6 {offsets = [0, 24], sizes = [8, 8], strides = [1, 1]} : vector<8x96xf32> to vector<8x8xf32>
    %56 = vector.extract_strided_slice %6 {offsets = [0, 56], sizes = [8, 8], strides = [1, 1]} : vector<8x96xf32> to vector<8x8xf32>
    %57 = vector.extract_strided_slice %6 {offsets = [0, 88], sizes = [8, 8], strides = [1, 1]} : vector<8x96xf32> to vector<8x8xf32>
    %cst_22 = arith.constant dense<0.000000e+00> : vector<8x8xf32>
    %58 = tpu.matmul %55, %56, %cst_22 {dimension_numbers = #tpu.dot_dimension_numbers<[1], [1], [0], [0], [0, 0, 1, 0], [], []>} : vector<8x8xf32>, vector<8x8xf32>, vector<8x8xf32> -> vector<8x8xf32>
    %cst_23 = arith.constant dense<0xFF800000> : vector<8xf32>
    %59 = vector.multi_reduction <maximumf>, %58, %cst_23 [1] : vector<8x8xf32> to vector<8xf32>
    %60 = vector.shape_cast %59 : vector<8xf32> to vector<8x1xf32>
    %61 = vector.broadcast %60 : vector<8x1xf32> to vector<8x8xf32>
    %62 = arith.subf %58, %61 : vector<8x8xf32>
    %63 = math.exp %62 : vector<8x8xf32>
    %cst_24 = arith.constant dense<0.000000e+00> : vector<8xf32>
    %64 = vector.multi_reduction <add>, %63, %cst_24 [1] : vector<8x8xf32> to vector<8xf32>
    %65 = vector.shape_cast %64 : vector<8xf32> to vector<8x1xf32>
    %cst_25 = arith.constant dense<0.000000e+00> : vector<8x8xf32>
    %66 = tpu.matmul %63, %57, %cst_25 {dimension_numbers = #tpu.dot_dimension_numbers<[1], [0], [0], [1], [0, 0, 1, 1], [], []>} : vector<8x8xf32>, vector<8x8xf32>, vector<8x8xf32> -> vector<8x8xf32>
    %67 = tpu.reciprocal %65 {approx = true} : vector<8x1xf32> -> vector<8x1xf32>
    %68 = vector.broadcast %67 : vector<8x1xf32> to vector<8x8xf32>
    %69 = arith.mulf %66, %68 : vector<8x8xf32>
    %c0_26 = arith.constant 0 : index
    %c24 = arith.constant 24 : index
    %70 = vector.load %arg15[%c0_26, %c24] : memref<8x32xf32, #tpu.memory_space<vmem>>, vector<8x8xf32>
    tpu.vector_store %arg15[%c0_26, %c24], %69 {strides = array<i32>} : memref<8x32xf32, #tpu.memory_space<vmem>>, vector<8x8xf32>,
    %c0_27 = arith.constant 0 : index
    %c0_28 = arith.constant 0 : index
    %71 = vector.load %arg15[%c0_27, %c0_28] : memref<8x32xf32, #tpu.memory_space<vmem>>, vector<8x32xf32>
    %c0_29 = arith.constant 0 : index
    %c0_30 = arith.constant 0 : index
    %72 = vector.load %arg4[%c0_29, %c0_30] : memref<32x32xf32, #tpu.memory_space<vmem>>, vector<32x32xf32>
    %cst_31 = arith.constant dense<0.000000e+00> : vector<8x32xf32>
    %73 = tpu.matmul %71, %72, %cst_31 {dimension_numbers = #tpu.dot_dimension_numbers<[1], [0], [0], [1], [0, 0, 1, 1], [], []>} : vector<8x32xf32>, vector<32x32xf32>, vector<8x32xf32> -> vector<8x32xf32>
    %c0_32 = arith.constant 0 : index
    %c0_33 = arith.constant 0 : index
    %74 = vector.load %arg5[%c0_32, %c0_33] : memref<1x32xf32, #tpu.memory_space<vmem>>, vector<1x32xf32>
    %75 = vector.broadcast %74 : vector<1x32xf32> to vector<8x32xf32>
    %76 = arith.addf %73, %75 : vector<8x32xf32>
    %77 = arith.addf %1, %76 : vector<8x32xf32>
    %cst_34 = arith.constant dense<0.000000e+00> : vector<8xf32>
    %78 = vector.multi_reduction <add>, %77, %cst_34 [1] : vector<8x32xf32> to vector<8xf32>
    %79 = vector.shape_cast %78 : vector<8xf32> to vector<8x1xf32>
    %cst_35 = arith.constant 3.200000e+01 : f32
    %80 = vector.broadcast %cst_35 : f32 to vector<8x1xf32>
    %81 = arith.divf %79, %80 : vector<8x1xf32>
    %82 = vector.broadcast %81 : vector<8x1xf32> to vector<8x32xf32>
    %83 = arith.subf %77, %82 : vector<8x32xf32>
    %84 = arith.mulf %83, %83 : vector<8x32xf32>
    %cst_36 = arith.constant dense<0.000000e+00> : vector<8xf32>
    %85 = vector.multi_reduction <add>, %84, %cst_36 [1] : vector<8x32xf32> to vector<8xf32>
    %86 = vector.shape_cast %85 : vector<8xf32> to vector<8x1xf32>
    %cst_37 = arith.constant 3.200000e+01 : f32
    %87 = vector.broadcast %cst_37 : f32 to vector<8x1xf32>
    %88 = arith.divf %86, %87 : vector<8x1xf32>
    %89 = vector.broadcast %81 : vector<8x1xf32> to vector<8x32xf32>
    %90 = arith.subf %77, %89 : vector<8x32xf32>
    %cst_38 = arith.constant 9.99999974E-6 : f32
    %91 = vector.broadcast %cst_38 : f32 to vector<8x1xf32>
    %92 = arith.addf %88, %91 : vector<8x1xf32>
    %93 = math.rsqrt %92 : vector<8x1xf32>
    %94 = vector.broadcast %93 : vector<8x1xf32> to vector<8x32xf32>
    %95 = arith.mulf %90, %94 : vector<8x32xf32>
    %c0_39 = arith.constant 0 : index
    %c0_40 = arith.constant 0 : index
    %96 = vector.load %arg10[%c0_39, %c0_40] : memref<1x32xf32, #tpu.memory_space<vmem>>, vector<1x32xf32>
    %97 = vector.broadcast %96 : vector<1x32xf32> to vector<8x32xf32>
    %98 = arith.mulf %95, %97 : vector<8x32xf32>
    %c0_41 = arith.constant 0 : index
    %c0_42 = arith.constant 0 : index
    %99 = vector.load %arg11[%c0_41, %c0_42] : memref<1x32xf32, #tpu.memory_space<vmem>>, vector<1x32xf32>
    %100 = vector.broadcast %99 : vector<1x32xf32> to vector<8x32xf32>
    %101 = arith.addf %98, %100 : vector<8x32xf32>
    %c0_43 = arith.constant 0 : index
    %c0_44 = arith.constant 0 : index
    %102 = vector.load %arg15[%c0_43, %c0_44] : memref<8x32xf32, #tpu.memory_space<vmem>>, vector<8x32xf32>
    tpu.vector_store %arg15[%c0_43, %c0_44], %101 {strides = array<i32>} : memref<8x32xf32, #tpu.memory_space<vmem>>, vector<8x32xf32>,
    %c0_45 = arith.constant 0 : index
    %c0_46 = arith.constant 0 : index
    %103 = vector.load %arg7[%c0_45, %c0_46] : memref<1x64xf32, #tpu.memory_space<vmem>>, vector<1x64xf32>
    %c0_47 = arith.constant 0 : index
    %c0_48 = arith.constant 0 : index
    %104 = vector.load %arg9[%c0_47, %c0_48] : memref<1x32xf32, #tpu.memory_space<vmem>>, vector<1x32xf32>
    %c0_49 = arith.constant 0 : index
    %c0_50 = arith.constant 0 : index
    %105 = vector.load %arg12[%c0_49, %c0_50] : memref<1x32xf32, #tpu.memory_space<vmem>>, vector<1x32xf32>
    %c0_51 = arith.constant 0 : index
    %c0_52 = arith.constant 0 : index
    %106 = vector.load %arg13[%c0_51, %c0_52] : memref<1x32xf32, #tpu.memory_space<vmem>>, vector<1x32xf32>
    %c0_i32 = arith.constant 0 : i32
    %c8_i32 = arith.constant 8 : i32
    %107 = arith.muli %c0_i32, %c8_i32 : i32
    %108 = tpu.assume_multiple %107, 8 : i32
    %109 = arith.index_cast %108 : i32 to index
    %c0_53 = arith.constant 0 : index
    %110 = vector.load %arg15[%109, %c0_53] : memref<8x32xf32, #tpu.memory_space<vmem>>, vector<8x32xf32>
    %c0_54 = arith.constant 0 : index
    %c0_55 = arith.constant 0 : index
    %111 = vector.load %arg6[%c0_54, %c0_55] : memref<32x64xf32, #tpu.memory_space<vmem>>, vector<32x64xf32>
    %cst_56 = arith.constant dense<0.000000e+00> : vector<8x64xf32>
    %112 = tpu.matmul %110, %111, %cst_56 {dimension_numbers = #tpu.dot_dimension_numbers<[1], [0], [0], [1], [0, 0, 1, 1], [], []>} : vector<8x32xf32>, vector<32x64xf32>, vector<8x64xf32> -> vector<8x64xf32>
    %113 = vector.broadcast %103 : vector<1x64xf32> to vector<8x64xf32>
    %114 = arith.addf %112, %113 : vector<8x64xf32>
    %cst_57 = arith.constant 0.000000e+00 : f32
    %115 = vector.broadcast %cst_57 : f32 to vector<8x64xf32>
    %116 = arith.maximumf %114, %115 : vector<8x64xf32>
    %c0_58 = arith.constant 0 : index
    %c0_59 = arith.constant 0 : index
    %117 = vector.load %arg8[%c0_58, %c0_59] : memref<64x32xf32, #tpu.memory_space<vmem>>, vector<64x32xf32>
    %cst_60 = arith.constant dense<0.000000e+00> : vector<8x32xf32>
    %118 = tpu.matmul %116, %117, %cst_60 {dimension_numbers = #tpu.dot_dimension_numbers<[1], [0], [0], [1], [0, 0, 1, 1], [], []>} : vector<8x64xf32>, vector<64x32xf32>, vector<8x32xf32> -> vector<8x32xf32>
    %119 = vector.broadcast %104 : vector<1x32xf32> to vector<8x32xf32>
    %120 = arith.addf %118, %119 : vector<8x32xf32>
    %121 = arith.addf %110, %120 : vector<8x32xf32>
    %cst_61 = arith.constant dense<0.000000e+00> : vector<8xf32>
    %122 = vector.multi_reduction <add>, %121, %cst_61 [1] : vector<8x32xf32> to vector<8xf32>
    %123 = vector.shape_cast %122 : vector<8xf32> to vector<8x1xf32>
    %cst_62 = arith.constant 3.200000e+01 : f32
    %124 = vector.broadcast %cst_62 : f32 to vector<8x1xf32>
    %125 = arith.divf %123, %124 : vector<8x1xf32>
    %126 = vector.broadcast %125 : vector<8x1xf32> to vector<8x32xf32>
    %127 = arith.subf %121, %126 : vector<8x32xf32>
    %128 = arith.mulf %127, %127 : vector<8x32xf32>
    %cst_63 = arith.constant dense<0.000000e+00> : vector<8xf32>
    %129 = vector.multi_reduction <add>, %128, %cst_63 [1] : vector<8x32xf32> to vector<8xf32>
    %130 = vector.shape_cast %129 : vector<8xf32> to vector<8x1xf32>
    %cst_64 = arith.constant 3.200000e+01 : f32
    %131 = vector.broadcast %cst_64 : f32 to vector<8x1xf32>
    %132 = arith.divf %130, %131 : vector<8x1xf32>
    %133 = vector.broadcast %125 : vector<8x1xf32> to vector<8x32xf32>
    %134 = arith.subf %121, %133 : vector<8x32xf32>
    %cst_65 = arith.constant 9.99999974E-6 : f32
    %135 = vector.broadcast %cst_65 : f32 to vector<8x1xf32>
    %136 = arith.addf %132, %135 : vector<8x1xf32>
    %137 = math.rsqrt %136 : vector<8x1xf32>
    %138 = vector.broadcast %137 : vector<8x1xf32> to vector<8x32xf32>
    %139 = arith.mulf %134, %138 : vector<8x32xf32>
    %140 = vector.broadcast %105 : vector<1x32xf32> to vector<8x32xf32>
    %141 = arith.mulf %139, %140 : vector<8x32xf32>
    %142 = vector.broadcast %106 : vector<1x32xf32> to vector<8x32xf32>
    %143 = arith.addf %141, %142 : vector<8x32xf32>
    %c0_66 = arith.constant 0 : index
    %144 = arith.index_cast %108 : i32 to index
    %c0_67 = arith.constant 0 : index
    %145 = vector.load %arg14[%c0_66, %144, %c0_67] : memref<1x8x32xf32, #tpu.memory_space<vmem>>, vector<1x8x32xf32>
    %146 = vector.shape_cast %145 : vector<1x8x32xf32> to vector<8x32xf32>
    %147 = vector.shape_cast %143 : vector<8x32xf32> to vector<1x8x32xf32>
    tpu.vector_store %arg14[%c0_66, %144, %c0_67], %147 {strides = array<i32>} : memref<1x8x32xf32, #tpu.memory_space<vmem>>, vector<1x8x32xf32>,
    %c1_i32 = arith.constant 1 : i32
    return
  }
  func.func @transform_0(%arg0: i32) -> (i32, i32, i32) {
    %c0_i32 = arith.constant 0 : i32
    %c0_i32_0 = arith.constant 0 : i32
    %c0_i32_1 = arith.constant 0 : i32
    return %arg0, %c0_i32, %c0_i32_0 : i32, i32, i32
  }
  func.func @transform_1(%arg0: i32) -> (i32, i32) {
    %c0_i32 = arith.constant 0 : i32
    %c0_i32_0 = arith.constant 0 : i32
    %c0_i32_1 = arith.constant 0 : i32
    return %c0_i32, %c0_i32_0 : i32, i32
  }
  func.func @transform_2(%arg0: i32) -> (i32, i32) {
    %c0_i32 = arith.constant 0 : i32
    %c0_i32_0 = arith.constant 0 : i32
    %c0_i32_1 = arith.constant 0 : i32
    return %c0_i32, %c0_i32_0 : i32, i32
  }
  func.func @transform_3(%arg0: i32) -> (i32, i32) {
    %c0_i32 = arith.constant 0 : i32
    %c0_i32_0 = arith.constant 0 : i32
    %c0_i32_1 = arith.constant 0 : i32
    return %c0_i32, %c0_i32_0 : i32, i32
  }
  func.func @transform_4(%arg0: i32) -> (i32, i32) {
    %c0_i32 = arith.constant 0 : i32
    %c0_i32_0 = arith.constant 0 : i32
    %c0_i32_1 = arith.constant 0 : i32
    return %c0_i32, %c0_i32_0 : i32, i32
  }
  func.func @transform_5(%arg0: i32) -> (i32, i32) {
    %c0_i32 = arith.constant 0 : i32
    %c0_i32_0 = arith.constant 0 : i32
    %c0_i32_1 = arith.constant 0 : i32
    return %c0_i32, %c0_i32_0 : i32, i32
  }
  func.func @transform_6(%arg0: i32) -> (i32, i32) {
    %c0_i32 = arith.constant 0 : i32
    %c0_i32_0 = arith.constant 0 : i32
    %c0_i32_1 = arith.constant 0 : i32
    return %c0_i32, %c0_i32_0 : i32, i32
  }
  func.func @transform_7(%arg0: i32) -> (i32, i32) {
    %c0_i32 = arith.constant 0 : i32
    %c0_i32_0 = arith.constant 0 : i32
    %c0_i32_1 = arith.constant 0 : i32
    return %c0_i32, %c0_i32_0 : i32, i32
  }
  func.func @transform_8(%arg0: i32) -> (i32, i32) {
    %c0_i32 = arith.constant 0 : i32
    %c0_i32_0 = arith.constant 0 : i32
    %c0_i32_1 = arith.constant 0 : i32
    return %c0_i32, %c0_i32_0 : i32, i32
  }
  func.func @transform_9(%arg0: i32) -> (i32, i32) {
    %c0_i32 = arith.constant 0 : i32
    %c0_i32_0 = arith.constant 0 : i32
    %c0_i32_1 = arith.constant 0 : i32
    return %c0_i32, %c0_i32_0 : i32, i32
  }
  func.func @transform_10(%arg0: i32) -> (i32, i32) {
    %c0_i32 = arith.constant 0 : i32
    %c0_i32_0 = arith.constant 0 : i32
    %c0_i32_1 = arith.constant 0 : i32
    return %c0_i32, %c0_i32_0 : i32, i32
  }
  func.func @transform_11(%arg0: i32) -> (i32, i32) {
    %c0_i32 = arith.constant 0 : i32
    %c0_i32_0 = arith.constant 0 : i32
    %c0_i32_1 = arith.constant 0 : i32
    return %c0_i32, %c0_i32_0 : i32, i32
  }
  func.func @transform_12(%arg0: i32) -> (i32, i32) {
    %c0_i32 = arith.constant 0 : i32
    %c0_i32_0 = arith.constant 0 : i32
    %c0_i32_1 = arith.constant 0 : i32
    return %c0_i32, %c0_i32_0 : i32, i32
  }
  func.func @transform_13(%arg0: i32) -> (i32, i32, i32) {
    %c0_i32 = arith.constant 0 : i32
    %c0_i32_0 = arith.constant 0 : i32
    %c0_i32_1 = arith.constant 0 : i32
    return %arg0, %c0_i32, %c0_i32_0 : i32, i32, i32
  }
}

</mosaic_0001>

<bundles_post_ra>
// kernel: tpu_custom_call.1
= control target key start
LH: loop header
LB: loop body
LE: loop exit
PB: predicated region body
PF: predicated region fallthrough
CT: control target
= control target key end

     0   :  { %s2375_s0 = inlined_call_operand.hbm [shape: f32[2,8,32], index: 0, kind: input, shape index: {}]   ;;  %s2376_s1 = inlined_call_operand.vmem [shape: f32[32,96], index: 1, kind: input, shape index: {}]   ;;  %s2377_s2 = inlined_call_operand.vmem [shape: f32[1,96], index: 2, kind: input, shape index: {}]   ;;  %s2378_s3 = inlined_call_operand.vmem [shape: f32[32,32], index: 3, kind: input, shape index: {}]   ;;  %s2379_s4 = inlined_call_operand.vmem [shape: f32[1,32], index: 4, kind: input, shape index: {}]   ;;  %s2380_s5 = inlined_call_operand.vmem [shape: f32[32,64], index: 5, kind: input, shape index: {}]   ;;  %s2381_s6 = inlined_call_operand.vmem [shape: f32[1,64], index: 6, kind: input, shape index: {}]   ;;  %s2382_s7 = inlined_call_operand.vmem [shape: f32[64,32], index: 7, kind: input, shape index: {}]   ;;  %s2383_s8 = inlined_call_operand.vmem [shape: f32[1,32], index: 8, kind: input, shape index: {}]   ;;  %s2384_s9 = inlined_call_operand.vmem [shape: f32[1,32], index: 9, kind: input, shape index: {}]   ;;  %s2385_s10 = inlined_call_operand.vmem [shape: f32[1,32], index: 10, kind: input, shape index: {}]   ;;  %s2386_s11 = inlined_call_operand.vmem [shape: f32[1,32], index: 11, kind: input, shape index: {}]   ;;  %s2387_s12 = inlined_call_operand.vmem [shape: f32[1,32], index: 12, kind: input, shape index: {}]   ;;  %s2388_s13 = inlined_call_operand.hbm [shape: f32[2,8,32], index: 13, kind: output, shape index: {}]  }
   0x1   :  { %2397 = sst [smem:[#allocation14_spill]] %s2388_s13 }
   0x2   :  { %18 = vsyncpa [#allocation4], 0 }
   0x3   :  { %20 = vsyncpa [#allocation4 + $0x1], 0 }
   0x4   :  { %21 = vsyncpa [#allocation5], 0 }
   0x5   :  { %23 = vsyncpa [#allocation5 + $0x1], 0  ;;  %s2060_s25 = smov 0   ;;  %s2062_s26 = smov 0  }
   0x6   :  { %s2064_s27 = smov 0   ;;  %s2066_s28 = smov 0  }
   0x7 LB: > { %2398 = sst [smem:[#allocation9_spill]] %s1958_s25  ;;  %s2081_s29 = sadd.s32 4294967295, %s1970_s28   ;;  %s1970_s28 = sphi %s2066_s28, %s2417_s28   ;;  %s1966_s27 = sphi %s2064_s27, %s2419_s27   ;;  %s1962_s26 = sphi %s2062_s26, %s2421_s26   ;;  %s1958_s25 = sphi %s2060_s25, %s2420_s25  }
   0x8   : > { %2399 = sst [smem:[#allocation10_spill]] %s1966_s27  ;;  %s1628_s30 = sadd.s32 4294967294, %s1970_s28  }
   0x9   : > { %s2085_s14 = sadd.s32 1, %s1970_s28   ;;  %s36_s15 = sadd.s32 1, %s1966_s27 }
   0xa   : > { %2400 = sst [smem:[#allocation11_spill]] %s2085_s14  ;;  %s33_s16 = ssub.s32 %s1970_s28, %s2085_s14 }
   0xb   : > { %p43_p0 = scmp.ne.s32.totalorder %s1966_s27, %s1962_s26  ;;  %p34_p1 = scmp.eq.s32.totalorder %s33_s16, 0 }
   0xc   : > { %p44_p2 = scmp.eq.s32.totalorder %s1970_s28, 0  ;;  %p49_p3 = scmp.ne.s32.totalorder %s1962_s26, %s1958_s25 }
   0xd   : > { %p50_p4 = scmp.eq.s32.totalorder %s2081_s29, 0  ;;  %p325_p7 = scmp.eq.s32.totalorder %s2081_s29, 1 }
   0xe   : > { %s2097_s17 = scalar_select %p34_p1, %s1966_s27, %s36_s15  }
   0xf   : > { %p2099_p5 = por %p44_p2, %p43_p0  ;;  %p2103_p6 = por %p50_p4, %p49_p3 }
  0x10   : > { %2401 = sst [smem:[#allocation12_spill]] %s2097_s17  ;;  %p331_p8 = scmp.eq.s32.totalorder %s1628_s30, 1 }
  0x11   : > { %s2403_s19 = scalar_select %p2103_p6, 1, 0 }
  0x12   : > { %p1808_p10 = scmp.lt.s32.totalorder %s1970_s28, 2  ;;  %p2110_p11 = por %p325_p7, %p43_p0 }
  0x13   : > { %p2114_p12 = por %p331_p8, %p49_p3  ;;  %s387_s22 = sand.u32 1, %s1966_s27  }
  0x14   : > { %s2404_s20 = scalar_select %p2110_p11, 1, 0 }
  0x15   : > { %s2405_s21 = scalar_select %p2114_p12, 1, 0 }
  0x16   : > { %s1632_s23 = sshll.u32 %s1970_s28, 7  ;;  %s1631_s24 = sshll.u32 %s387_s22, 3 }
  0x17   : > { %2406 = sst [smem:[#allocation13_spill]] %s2405_s21  ;;  %s2123_s17 = scalar_lea.hbm %s2375_s0, %s1632_s23 }
  0x18   : > { %s391_s30 = scalar_lea.vmem [#allocation3], %s1631_s24  ;;  %p2127_p13 = pnand %p1808_p10, %p2099_p5 }
  0x19   : > { %s398_s14 = sshll.u32 %s391_s30, 4  ;;  %s388_s27 = scalar_lea.sflag [#allocation4], %s387_s22  ;;  %s2131_s14 = int_to_ptr.vmem [resolvable:$true] %s398_s14 }
  0x1a   : > { %s1878_s21 = scalar_lea.hbm %s2123_s17, 128  ;;  %p1880_p3 = pneg %p2127_p13 }
  0x1b   : > { %p1879_p2 = scmp.ne.s32.totalorder %s2123_s17, %s1878_s21  ;;  %s1883_s18 = scalar_lea.hbm %s2375_s0, 256 }
  0x1c   : > { %p1884_p5 = scmp.lt.s32.totalorder %s2123_s17, %s2375_s0  ;;  %p1885_p8 = scmp.lt.s32.totalorder %s1883_s18, %s1878_s21 }
  0x1d   : > { %p1881_p4 = pnand %p1880_p3, %p1879_p2 }
  0x1e   : > { %p1886_p10 = por %p1885_p8, %p1884_p5 }
  0x1f   : > { %p1882_p7 = pneg %p1881_p4 }
  0x21   : > { %p1887_p9 = pnand %p1886_p10, %p1882_p7 }
  0x23   : > { %1890 = shalt.err (!%p1887_p9)
}
  0x24   : > { %s1891_s22 = scalar_lea.vmem %s2131_s14, 128  ;;  %s1972_s30 = smov [#allocation3]  }
  0x25   : > { %p1892_p0 = scmp.ne.s32.totalorder %s2131_s14, %s1891_s22  ;;  %s1896_s13 = sshll.u32 %s1972_s30, 4  ;;  %s1897_s13 = int_to_ptr.vmem [resolvable:$false] %s1896_s13 }
  0x26   : > { %s1898_s23 = scalar_lea.vmem %s1897_s13, 256  ;;  %p1899_p4 = scmp.lt.s32.totalorder %s2131_s14, %s1897_s13 }
  0x27   : > { %p1894_p1 = pnand %p1892_p0, %p1880_p3  ;;  %p1900_p12 = scmp.lt.s32.totalorder %s1898_s23, %s1891_s22 }
  0x29   : > { %p1895_p2 = pneg %p1894_p1  ;;  %p1901_p11 = por %p1900_p12, %p1899_p4 }
  0x2b   : > { %p1902_p6 = pnand %p1901_p11, %p1895_p2 }
  0x2d   : > { %1905 = shalt.err (!%p1902_p6)
}
  0x2e   : > { %1803 = dma.hbm_to_vmem [thread:$0]  (!%p2127_p13), %s2123_s17, 128, %s2131_s14, %s388_s27  }
  0x2f   : > { %p2408_p9 = scmp.lt.s32.totalorder %s1970_s28, 3  ;;  %p2409_p7 = scmp.ge.s32.totalorder %s1970_s28, 1 }
  0x31   : > { %p404_p0 = pnand %p2409_p7, %p2408_p9 }
  0x32   : > { %s2158_s21 = sand.u32 (!%p404_p0), 1, %s1962_s26   ;;  %p2410_p6 = scmp.ne.s32.totalorder (!%p404_p0), %s2403_s19, 0 }
  0x33   : > { %407 = sbr.rel (%p404_p0) target bundleno = 2329 (0x919), region = 72  ;;  %s1634_s13 = sshll.u32 (!%p404_p0), %s2158_s21, 3 }
  0x34   : > { %s410_s24 = scalar_lea.sflag (!%p404_p0), [#allocation4], %s2158_s21  ;;  %s413_s25 = scalar_lea.vmem (!%p404_p0), [#allocation3], %s1634_s13 }
  0x38   : > { %1949 = dma.done.wait (%p2410_p6), %s410_s24, 128  }
  0x39   : > { %1951 = vsyncadd (%p2410_p6), %s410_s24, 4294967168  ;;  %v1973_v0 = vmov 0.0   ;;  %vm1974_vm0 = vmmov 0   ;;  %v460_v1 = vld [vmem:[%s2376_s1 + $0x18] sm:$0xff]  ;;  %v459_v2 = vld [vmem:[%s2376_s1 + $0x10] sm:$0xff]  ;;  %vm468_vm1 = vcmask 261120  }
  0x3a   : > { %1704 = vmatprep.subr.mxu1 %v1973_v0  ;;  %1712 = vmatprep.mubr.msk.f32.mxu1 %vm1974_vm0, %v1973_v0  ;;  %v458_v3 = vld [vmem:[%s2376_s1 + $0x8] sm:$0xff]  ;;  %v457_v4 = vld [vmem:[%s2376_s1] sm:$0xff]  ;;  %s1975_s24 = smov 120   ;;  %s1977_s27 = smov 80   ;;  %vm545_vm2 = vcmask 64512   ;;  %vm877_vm3 = vcmask 130112  }
  0x3b   : > { %1725 = vmatprep.subr.mxu0 %v1973_v0  ;;  %1727 = vmatprep.mubr.msk.f32.mxu0 %vm1974_vm0, %v1973_v0  ;;  %v2188_v5 = vld [vmem:[%s413_s25] sm:$0xff]  ;;  %v1636_v6 = vld [vmem:[%s2377_s2] ss:$0 sm:$0xff]  ;;  %s1976_s25 = smov 96   ;;  %s1978_s14 = smov 88   ;;  %vm1048_vm4 = vcmask 195712  }
  0x3c   : > { %1705 = vmatpush3.msra.mxu1 %v460_v1  ;;  %s1979_s17 = smov 72   ;;  %s1980_s18 = smov 112   ;;  %vm1219_vm5 = vcmask 261312   ;;  %vm1441_vm6 = vcmask 523264  }
  0x3d   : > { %1706 = vmatprep.subr.mxu1 %v1973_v0  ;;  %s1981_s19 = smov 104   ;;  %s1982_s15 = smov 56  }
  0x3e   : > { %1707 = vmatpush3.msra.mxu1 %v459_v2  ;;  %s1983_s16 = smov 64   ;;  %s1984_s22 = smov 40  }
  0x3f   : > { %1708 = vmatprep.subr.mxu1 %v1973_v0  ;;  %s1985_s30 = smov 48   ;;  %s1986_s23 = smov 8  }
  0x40   : > { %1709 = vmatpush3.msra.mxu1 %v458_v3  ;;  %p2412_p12 = scmp.ne.s32.totalorder %s2404_s20, 0 }
  0x41   : > { %1710 = vmatprep.subr.mxu1 %v1973_v0 }
  0x42   : > { %1711 = vmatpush3.msra.mxu1 %v457_v4 }
  0x43   : > { %1713 = vmatmul.mubr.msk.f32.vlgmr.msra.gmra.mxu1 %vm468_vm1, %v2188_v5  ;;  %1715 = vmatprep.subr.mxu1 %v1973_v0 }
  0x44   : > { %1717 = vmatprep.mubr.msk.f32.mxu1 %vm1974_vm0, %v1973_v0 }
 0x103   : > { %v538_v7 = vpop.f32.mrf.mxu1 }
 0x104   : > { %v539_v8 = vadd.f32 %v1636_v6, %v538_v7  ;;  %v1225_v7 = vld [vmem:[%s2378_s3 + $0x18] sm:$0xff] }
 0x105   : > { %v1714_v9 = vpop.f32.mrf.mxu1 }
 0x106   : > { %708 = vrot.lane.b32.xlu1 %v539_v8, %s1975_s24  ;;  %543 = vrot.lane.b32.xlu0 %v539_v8, %s1976_s25  ;;  %s1987_s24 = smov 16   ;;  %v1223_v9 = vld [vmem:[%s2378_s3 + $0x8] sm:$0xff]  ;;  %s455_s25 = scalar_lea.vmem [#allocation6], %s1634_s13 }
 0x10a   : > { %881 = vrot.lane.b32.xlu1 %v539_v8, %s1977_s27  ;;  %710 = vrot.lane.b32.xlu0 %v539_v8, %s1978_s14  ;;  %s1558_s27 = sshll.u32 %s455_s25, 4  ;;  %s1559_s27 = int_to_ptr.vmem [resolvable:$true] %s1558_s27 }
 0x10e   : > { %1052 = vrot.lane.b32.xlu1 %v539_v8, %s1979_s17  ;;  %879 = vrot.lane.b32.xlu0 %v539_v8, %s1980_s18  ;;  %s2411_s18 = sld [smem:[#allocation14_spill]] }
 0x112   : > { %1050 = vrot.lane.b32.xlu0 %v539_v8, %s1981_s19 }
 0x178   : > { %v709_v10 = vpop.permute.xlu1 %708  ;;  %v544_v11 = vpop.permute.xlu0 %543 }
 0x179   : > { %1716 = vmatpush3.xpose.msk.msra.mxu1 %vm545_vm2, %v544_v11 }
 0x17a   : > { %1720 = vmatprep.subr.mxu1 %v1973_v0 }
 0x17c   : > { %1718 = vmatmul.mubr.msk.f32.vlgmr.msra.gmra.mxu1 %vm545_vm2, %v539_v8  ;;  %v711_v12 = vpop.permute.xlu0 %710  ;;  %v882_v13 = vpop.permute.xlu1 %881 }
 0x17d   : > { %1726 = vmatpush3.xpose.msk.msra.mxu0 %vm545_vm2, %v711_v12  ;;  %1722 = vmatprep.mubr.msk.f32.mxu1 %vm1974_vm0, %v1973_v0 }
 0x17e   : > { %1735 = vmatprep.subr.mxu0 %v1973_v0 }
 0x180   : > { %1728 = vmatmul.mubr.msk.f32.vlgmr.msra.gmra.mxu0 %vm545_vm2, %v709_v10  ;;  %v880_v14 = vpop.permute.xlu0 %879  ;;  %v1053_v15 = vpop.permute.xlu1 %1052  ;;  %v1222_v10 = vld [vmem:[%s2378_s3] sm:$0xff] }
 0x181   : > { %1736 = vmatpush3.xpose.msk.msra.mxu0 %vm545_vm2, %v882_v13  ;;  %1737 = vmatprep.mubr.msk.f32.mxu0 %vm1974_vm0, %v1973_v0 }
 0x182   : > { %1745 = vmatprep.subr.mxu0 %v1973_v0 }
 0x184   : > { %1738 = vmatmul.mubr.msk.f32.vlgmr.msra.gmra.mxu0 %vm545_vm2, %v880_v14  ;;  %v1051_v16 = vpop.permute.xlu0 %1050 }
 0x185   : > { %1746 = vmatpush3.xpose.msk.msra.mxu0 %vm545_vm2, %v1053_v15  ;;  %1747 = vmatprep.mubr.msk.f32.mxu0 %vm1974_vm0, %v1973_v0 }
 0x186   : > { %1755 = vmatprep.subr.mxu0 %v1973_v0 }
 0x188   : > { %1748 = vmatmul.mubr.msk.f32.vlgmr.msra.gmra.mxu0 %vm545_vm2, %v1051_v16 }
 0x189   : > { %1763 = vmatprep.mubr.msk.f32.mxu0 %vm1974_vm0, %v1973_v0  ;;  %1756 = vmatpush3.msra.mxu0 %v1225_v7 }
 0x18a   : > { %1757 = vmatprep.subr.mxu0 %v1973_v0 }
 0x23c   : > { %v616_v17 = vpop.f32.mrf.mxu1 }
 0x23d   : > { %v620_v18 = vsel %vm545_vm2, %v616_v17, -inf }
 0x23e   : > { %621 = vmax.xlane.f32.xlu1 %v620_v18  ;;  %v1719_v19 = vpop.f32.mrf.mxu1 }
 0x23f   : > { %v1650_v19 = vld [vmem:[%s2379_s4] ss:$0 sm:$0xff] }
 0x240   : > { %v782_v20 = vpop.f32.mrf.mxu0 }
 0x241   : > { %v786_v21 = vsel %vm545_vm2, %v782_v20, -inf }
 0x242   : > { %787 = vmax.xlane.f32.xlu0 %v786_v21  ;;  %v1729_v22 = vpop.f32.mrf.mxu0 }
 0x244   : > { %v953_v23 = vpop.f32.mrf.mxu0 }
 0x245   : > { %v957_v24 = vsel %vm545_vm2, %v953_v23, -inf }
 0x246   : > { %958 = vmax.xlane.f32.xlu0 %v957_v24  ;;  %v1739_v25 = vpop.f32.mrf.mxu0 }
 0x248   : > { %v1124_v26 = vpop.f32.mrf.mxu0 }
 0x249   : > { %v1128_v28 = vsel %vm545_vm2, %v1124_v26, -inf }
 0x24a   : > { %v1749_v27 = vpop.f32.mrf.mxu0 }
 0x24f   : > { %795 = vrot.lane.b32.xlu1 %v539_v8, %s1982_s15  ;;  %s1545_s15 = scalar_lea.sflag [#allocation5], %s2158_s21 }
 0x25c   : > { %629 = vrot.lane.b32.xlu0 %v539_v8, %s1983_s16  ;;  %s1906_s16 = scalar_lea.vmem %s1559_s27, 128 }
 0x25d   : > { %p1907_p11 = scmp.ne.s32.totalorder %s1559_s27, %s1906_s16 }
 0x25f   : > { %p1908_p13 = pnand %p1907_p11, %p2412_p12 }
 0x260   : > { %1137 = vrot.lane.b32.xlu0 %v539_v8, %s1984_s22  ;;  %s1988_s22 = smov 24  }
 0x261   : > { %p1909_p1 = pneg %p1908_p13 }
 0x273   : > { %1129 = vmax.xlane.f32.xlu1 %v1128_v28 }
 0x284   : > { %966 = vrot.lane.b32.xlu1 %v539_v8, %s1985_s30  ;;  %v1224_v8 = vld [vmem:[%s2378_s3 + $0x10] sm:$0xff] }
 0x285   : > { %1758 = vmatpush3.msra.mxu0 %v1224_v8  ;;  %v1658_v8 = vld [vmem:[%s2386_s11] ss:$0 sm:$0xff] }
 0x286   : > { %1759 = vmatprep.subr.mxu0 %v1973_v0 }
 0x287   : > { %1760 = vmatpush3.msra.mxu0 %v1223_v9 }
 0x288   : > { %1761 = vmatprep.subr.mxu0 %v1973_v0 }
 0x289   : > { %1762 = vmatpush3.msra.mxu0 %v1222_v10  ;;  %v1659_v10 = vld [vmem:[%s2387_s12] ss:$0 sm:$0xff] }
 0x28a   : > { %1777 = vmatprep.subr.mxu0 %v1973_v0 }
 0x2c7   : > { %v622_v29 = vpop.xlane.xlu1 %621 }
 0x2c8   : > { %v623_v30 = vsub.f32 %v616_v17, %v622_v29 }
 0x2ca   : > { %v624_v31 = vmul.f32 1.442695, %v623_v30  ;;  %v1346_v30 = vld [vmem:[%s2380_s5 + $0x18] sm:$0xff] }
 0x2cb   : > { %v788_v32 = vpop.xlane.xlu0 %787  ;;  %v796_v40 = vpop.permute.xlu1 %795 }
 0x2cc   : > { %1858 = vpow2.f32 %v624_v31  ;;  %v789_v33 = vsub.f32 %v782_v20, %v788_v32  ;;  %v1345_v31 = vld [vmem:[%s2380_s5 + $0x10] sm:$0xff]  ;;  %v1343_v32 = vld [vmem:[%s2380_s5] sm:$0xff] }
 0x2ce   : > { %v790_v34 = vmul.f32 1.442695, %v789_v33  ;;  %v1434_v33 = vld [vmem:[%s2382_s7 + $0x38] sm:$0xff] }
 0x2cf   : > { %v959_v35 = vpop.xlane.xlu0 %958 }
 0x2d0   : > { %1860 = vpow2.f32 %v790_v34  ;;  %v960_v36 = vsub.f32 %v953_v23, %v959_v35  ;;  %v1433_v34 = vld [vmem:[%s2382_s7 + $0x30] sm:$0xff]  ;;  %v1432_v35 = vld [vmem:[%s2382_s7 + $0x28] sm:$0xff] }
 0x2d2   : > { %v961_v37 = vmul.f32 1.442695, %v960_v36  ;;  %v1431_v36 = vld [vmem:[%s2382_s7 + $0x20] sm:$0xff] }
 0x2d3   : > { %v630_v38 = vpop.permute.xlu0 %629 }
 0x2d4   : > { %1862 = vpow2.f32 %v961_v37  ;;  %1721 = vmatpush3.msra.mxu1 %v630_v38  ;;  %v1430_v37 = vld [vmem:[%s2382_s7 + $0x18] sm:$0xff] }
 0x2d5   : > { %1730 = vmatprep.subr.mxu1 %v1973_v0 }
 0x2d7   : > { %v1138_v50 = vpop.permute.xlu0 %1137 }
 0x2d9   : > { %v1859_v39 = vpop.eup %1858 }
 0x2da   : > { %1723 = vmatmul.mubr.msk.f32.vlgmr.msra.gmra.mxu1 %vm545_vm2, %v1859_v39  ;;  %v626_v45 = vsel %vm545_vm2, %v1859_v39, 0.0 }
 0x2db   : > { %1731 = vmatpush3.msra.mxu1 %v796_v40  ;;  %1732 = vmatprep.mubr.msk.f32.mxu1 %vm1974_vm0, %v1973_v0 }
 0x2dc   : > { %1740 = vmatprep.subr.mxu1 %v1973_v0 }
 0x2dd   : > { %v1861_v41 = vpop.eup %1860 }
 0x2de   : > { %1733 = vmatmul.mubr.msk.f32.vlgmr.msra.gmra.mxu1 %vm545_vm2, %v1861_v41  ;;  %v792_v42 = vsel %vm545_vm2, %v1861_v41, 0.0 }
 0x2df   : > { %793 = vadd.xlane.f32.xlu1 %v792_v42  ;;  %1742 = vmatprep.mubr.msk.f32.mxu1 %vm1974_vm0, %v1973_v0  ;;  %v1652_v42 = vld [vmem:[%s2384_s9] ss:$0 sm:$0xff] }
 0x2e1   : > { %v1863_v43 = vpop.eup %1862 }
 0x2e2   : > { %v963_v44 = vsel %vm545_vm2, %v1863_v43, 0.0 }
 0x2e3   : > { %964 = vadd.xlane.f32.xlu0 %v963_v44  ;;  %627 = vadd.xlane.f32.xlu1 %v626_v45  ;;  %v1653_v44 = vld [vmem:[%s2385_s10] ss:$0 sm:$0xff] }
 0x2fc   : > { %v1130_v46 = vpop.xlane.xlu1 %1129 }
 0x2fd   : > { %v1131_v47 = vsub.f32 %v1124_v26, %v1130_v46 }
 0x2ff   : > { %v1132_v48 = vmul.f32 1.442695, %v1131_v47 }
 0x300   : > { %v967_v49 = vpop.permute.xlu1 %966 }
 0x301   : > { %1864 = vpow2.f32 %v1132_v48  ;;  %1741 = vmatpush3.msra.mxu1 %v967_v49  ;;  %v1429_v48 = vld [vmem:[%s2382_s7 + $0x10] sm:$0xff]  ;;  %v1428_v49 = vld [vmem:[%s2382_s7 + $0x8] sm:$0xff] }
 0x302   : > { %1743 = vmatmul.mubr.msk.f32.vlgmr.msra.gmra.mxu1 %vm545_vm2, %v1863_v43  ;;  %1750 = vmatprep.subr.mxu1 %v1973_v0 }
 0x303   : > { %1751 = vmatpush3.msra.mxu1 %v1138_v50  ;;  %1752 = vmatprep.mubr.msk.f32.mxu1 %vm1974_vm0, %v1973_v0  ;;  %v1427_v50 = vld [vmem:[%s2382_s7] sm:$0xff] }
 0x304   : > { %1766 = vmatprep.subr.mxu1 %v1973_v0 }
 0x30e   : > { %v1865_v51 = vpop.eup %1864 }
 0x30f   : > { %1753 = vmatmul.mubr.msk.f32.vlgmr.msra.gmra.mxu1 %vm545_vm2, %v1865_v51  ;;  %v1134_v52 = vsel %vm545_vm2, %v1865_v51, 0.0  ;;  %v1654_v51 = vld [vmem:[%s2381_s6] ss:$0 sm:$0xff] }
 0x310   : > { %1135 = vadd.xlane.f32.xlu0 %v1134_v52  ;;  %1774 = vmatprep.mubr.msk.f32.mxu1 %vm1974_vm0, %v1973_v0 }
 0x311   : > { %1767 = vmatpush3.msra.mxu1 %v1346_v30 }
 0x312   : > { %1768 = vmatprep.subr.mxu1 %v1973_v0 }
 0x313   : > { %1769 = vmatpush3.msra.mxu1 %v1345_v31 }
 0x314   : > { %1770 = vmatprep.subr.mxu1 %v1973_v0 }
 0x368   : > { %v794_v53 = vpop.xlane.xlu1 %793 }
 0x36c   : > { %v628_v54 = vpop.xlane.xlu1 %627  ;;  %v965_v63 = vpop.xlane.xlu0 %964 }
 0x36d   : > { %1866 = vrcp.f32 %v628_v54 }
 0x36e   : > { %1868 = vrcp.f32 %v794_v53 }
 0x36f   : > { %1870 = vrcp.f32 %v965_v63 }
 0x37a   : > { %v1867_v55 = vpop.eup %1866 }
 0x37b   : > { %v1869_v59 = vpop.eup %1868 }
 0x37c   : > { %v1871_v2 = vpop.eup %1870 }
 0x399   : > { %v1136_v1 = vpop.xlane.xlu0 %1135 }
 0x39a   : > { %v701_v56 = vpop.f32.mrf.mxu1  ;;  %1872 = vrcp.f32 %v1136_v1 }
 0x39b   : > { %v706_v57 = vmul.f32 %v1867_v55, %v701_v56  ;;  %v1656_v56 = vld [vmem:[%s2383_s8] ss:$0 sm:$0xff] }
 0x39c   : > { %v1724_v58 = vpop.f32.mrf.mxu1 }
 0x39d   : > { %707 = vst.msk [vmem:[#allocation2] sm:$0xff] %vm545_vm2, %v706_v57 }
 0x39e   : > { %v867_v60 = vpop.f32.mrf.mxu1 }
 0x39f   : > { %v872_v61 = vmul.f32 %v1869_v59, %v867_v60 }
 0x3a0   : > { %v1734_v62 = vpop.f32.mrf.mxu1 }
 0x3a1   : > { %874 = vrot.lane.b32.xlu0 %v872_v61, %s1986_s23 }
 0x3a7   : > { %v1873_v11 = vpop.eup %1872 }
 0x3c2   : > { %v1038_v3 = vpop.f32.mrf.mxu1 }
 0x3c3   : > { %v1043_v4 = vmul.f32 %v1871_v2, %v1038_v3 }
 0x3c4   : > { %v1744_v6 = vpop.f32.mrf.mxu1 }
 0x3c5   : > { %1045 = vrot.lane.b32.xlu1 %v1043_v4, %s1987_s24  ;;  %s1661_s24 = sshll.u32 %s2081_s29, 7 }
 0x3c6   : > { %s1556_s19 = scalar_lea.hbm %s2411_s18, %s1661_s24 }
 0x3cf   : > { %v1209_v12 = vpop.f32.mrf.mxu1 }
 0x3d0   : > { %v1214_v13 = vmul.f32 %v1873_v11, %v1209_v12 }
 0x3d1   : > { %v1754_v14 = vpop.f32.mrf.mxu1 }
 0x3d2   : > { %1216 = vrot.lane.b32.xlu1 %v1214_v13, %s1988_s22  ;;  %s1989_s22 = smov [#allocation6]  }
 0x3d3   : > { %s1910_s29 = sshll.u32 %s1989_s22, 4  ;;  %s1911_s29 = int_to_ptr.vmem [resolvable:$false] %s1910_s29 }
 0x3d4   : > { %s1912_s13 = scalar_lea.vmem %s1911_s29, 256  ;;  %p1913_p3 = scmp.lt.s32.totalorder %s1559_s27, %s1911_s29 }
 0x3d5   : > { %p1914_p5 = scmp.lt.s32.totalorder %s1912_s13, %s1906_s16 }
 0x3d7   : > { %p1915_p8 = por %p1914_p5, %p1913_p3 }
 0x3d9   : > { %p1916_p10 = pnand %p1915_p8, %p1909_p1 }
 0x413   : > { %v875_v15 = vpop.permute.xlu0 %874 }
 0x414   : > { %878 = vst.msk [vmem:[#allocation2] sm:$0xff] %vm877_vm3, %v875_v15 }
 0x437   : > { %v1046_v16 = vpop.permute.xlu1 %1045 }
 0x438   : > { %1049 = vst.msk [vmem:[#allocation2] sm:$0xff] %vm1048_vm4, %v1046_v16 }
 0x444   : > { %v1217_v17 = vpop.permute.xlu1 %1216 }
 0x445   : > { %1220 = vst.msk [vmem:[#allocation2] sm:$0xff] %vm1219_vm5, %v1217_v17 }
 0x44c   : > { %v1221_v18 = vld [vmem:[#allocation2] sm:$0xff] }
 0x44d   : > { %1764 = vmatmul.mubr.msk.f32.vlgmr.msra.gmra.mxu0 %vm468_vm1, %v1221_v18 }
 0x44e   : > { %1793 = vmatprep.mubr.msk.f32.mxu0 %vm1974_vm0, %v1973_v0  ;;  %1778 = vmatpush3.msra.mxu0 %v1434_v33 }
 0x44f   : > { %1779 = vmatprep.subr.mxu0 %v1973_v0 }
 0x450   : > { %1780 = vmatpush3.msra.mxu0 %v1433_v34 }
 0x451   : > { %1781 = vmatprep.subr.mxu0 %v1973_v0 }
 0x452   : > { %1782 = vmatpush3.msra.mxu0 %v1432_v35 }
 0x453   : > { %1783 = vmatprep.subr.mxu0 %v1973_v0 }
 0x454   : > { %1784 = vmatpush3.msra.mxu0 %v1431_v36 }
 0x455   : > { %1785 = vmatprep.subr.mxu0 %v1973_v0 }
 0x456   : > { %1786 = vmatpush3.msra.mxu0 %v1430_v37 }
 0x457   : > { %1787 = vmatprep.subr.mxu0 %v1973_v0 }
 0x458   : > { %1788 = vmatpush3.msra.mxu0 %v1429_v48 }
 0x459   : > { %1789 = vmatprep.subr.mxu0 %v1973_v0 }
 0x45a   : > { %1790 = vmatpush3.msra.mxu0 %v1428_v49 }
 0x45b   : > { %1791 = vmatprep.subr.mxu0 %v1973_v0 }
 0x45c   : > { %1792 = vmatpush3.msra.mxu0 %v1427_v50 }
 0x50d   : > { %v1302_v20 = vpop.f32.mrf.mxu0 }
 0x50e   : > { %v1303_v21 = vadd.f32 %v1650_v19, %v1302_v20 }
 0x50f   : > { %v1765_v22 = vpop.f32.mrf.mxu0 }
 0x510   : > { %v1306_v23 = vadd.f32 %v1303_v21, %v2188_v5  ;;  %v1344_v5 = vld [vmem:[%s2380_s5 + $0x8] sm:$0xff] }
 0x511   : > { %1771 = vmatpush3.msra.mxu1 %v1344_v5 }
 0x512   : > { %v1307_v24 = vsel %vm468_vm1, %v1306_v23, 0.0  ;;  %1772 = vmatprep.subr.mxu1 %v1973_v0 }
 0x513   : > { %1308 = vadd.xlane.f32.xlu0 %v1307_v24  ;;  %1773 = vmatpush3.msra.mxu1 %v1343_v32 }
 0x59c   : > { %v1309_v25 = vpop.xlane.xlu0 %1308 }
 0x59d   : > { %v1311_v26 = vmul.f32 0.03125, %v1309_v25 }
 0x59f   : > { %v1312_v27 = vsub.f32 %v1306_v23, %v1311_v26 }
 0x5a1   : > { %v1313_v28 = vmul.f32 %v1312_v27, %v1312_v27 }
 0x5a3   : > { %v1314_v29 = vsel %vm468_vm1, %v1313_v28, 0.0 }
 0x5a4   : > { %1315 = vadd.xlane.f32.xlu1 %v1314_v29 }
 0x62d   : > { %v1316_v38 = vpop.xlane.xlu1 %1315 }
 0x62e   : > { %v1317_v39 = vmul.f32 0.03125, %v1316_v38 }
 0x630   : > { %v1318_v40 = vadd.f32 1e-05, %v1317_v39 }
 0x632   : > { %1874 = vrsqrt.f32 %v1318_v40 }
 0x63f   : > { %v1875_v41 = vpop.eup %1874 }
 0x640   : > { %v1320_v43 = vmul.f32 %v1875_v41, %v1312_v27 }
 0x642   : > { %v1328_v45 = vmul.f32 %v1652_v42, %v1320_v43 }
 0x644   : > { %v1336_v46 = vadd.f32 %v1653_v44, %v1328_v45 }
 0x646   : > { %1337 = vst.msk [vmem:[#allocation2] sm:$0xff] %vm468_vm1, %v1336_v46 }
 0x64d   : > { %v1342_v47 = vld [vmem:[#allocation2] sm:$0xff] }
 0x64e   : > { %1775 = vmatmul.mubr.msk.f32.vlgmr.msra.gmra.mxu1 %vm468_vm1, %v1342_v47 }
 0x70e   : > { %v1422_v52 = vpop.f32.mrf.mxu1 }
 0x70f   : > { %v1423_v53 = vadd.f32 %v1654_v51, %v1422_v52 }
 0x710   : > { %v1776_v54 = vpop.f32.mrf.mxu1 }
 0x711   : > { %v1426_v55 = vmax.f32 %v1423_v53, 0.0 }
 0x713   : > { %1794 = vmatmul.mubr.msk.f32.vlgmr.msra.gmra.mxu0 %vm1441_vm6, %v1426_v55 }
 0x7d3   : > { %v1511_v57 = vpop.f32.mrf.mxu0 }
 0x7d4   : > { %v1512_v58 = vadd.f32 %v1656_v56, %v1511_v57 }
 0x7d5   : > { %v1795_v59 = vpop.f32.mrf.mxu0 }
 0x7d6   : > { %v1515_v60 = vadd.f32 %v1512_v58, %v1342_v47 }
 0x7d8   : > { %v1516_v0 = vsel %vm468_vm1, %v1515_v60, 0.0 }
 0x7d9   : > { %1517 = vadd.xlane.f32.xlu0 %v1516_v0 }
 0x862   : > { %v1518_v61 = vpop.xlane.xlu0 %1517 }
 0x863   : > { %v1519_v62 = vmul.f32 0.03125, %v1518_v61 }
 0x865   : > { %v1520_v63 = vsub.f32 %v1515_v60, %v1519_v62 }
 0x867   : > { %v1521_v1 = vmul.f32 %v1520_v63, %v1520_v63 }
 0x869   : > { %v1522_v2 = vsel %vm468_vm1, %v1521_v1, 0.0 }
 0x86a   : > { %1523 = vadd.xlane.f32.xlu0 %v1522_v2 }
 0x8f3   : > { %v1524_v3 = vpop.xlane.xlu0 %1523 }
 0x8f4   : > { %v1525_v4 = vmul.f32 0.03125, %v1524_v3 }
 0x8f6   : > { %v1526_v6 = vadd.f32 1e-05, %v1525_v4 }
 0x8f8   : > { %1876 = vrsqrt.f32 %v1526_v6 }
 0x905   : > { %v1877_v7 = vpop.eup %1876 }
 0x906   : > { %v1528_v9 = vmul.f32 %v1877_v7, %v1520_v63 }
 0x908   : > { %v1535_v11 = vmul.f32 %v1658_v8, %v1528_v9 }
 0x90a   : > { %v1542_v12 = vadd.f32 %v1659_v10, %v1535_v11 }
 0x90c   : > { %1543 = vst.msk [vmem:[%s455_s25] sm:$0xff] %vm468_vm1, %v1542_v12 }
 0x90d   : > { %1919 = shalt.err (!%p1916_p10)
}
 0x90e   : > { %s1920_s30 = scalar_lea.hbm %s1556_s19, 128  ;;  %s1924_s24 = scalar_lea.hbm %s2411_s18, 256 }
 0x90f   : > { %p1921_p2 = scmp.ne.s32.totalorder %s1556_s19, %s1920_s30  ;;  %p1925_p7 = scmp.lt.s32.totalorder %s1556_s19, %s2411_s18 }
 0x910   : > { %p1926_p0 = scmp.lt.s32.totalorder %s1924_s24, %s1920_s30 }
 0x911   : > { %p1922_p4 = pnand %p1921_p2, %p2412_p12 }
 0x912   : > { %p1927_p6 = por %p1926_p0, %p1925_p7 }
 0x913   : > { %p1923_p9 = pneg %p1922_p4 }
 0x915   : > { %p1928_p11 = pnand %p1927_p6, %p1923_p9 }
 0x917   : > { %1931 = shalt.err (!%p1928_p11)
}
 0x918   : > { %1798 = dma.vmem_to_hbm [thread:$0]  (%p2412_p12), %s1559_s27, 128, %s1556_s19, %s1545_s15  }
 0x919 PF: > { %s2413_s17 = sld [smem:[#allocation9_spill]]  ;;  %p2416_p1 = scmp.ge.s32.totalorder %s1970_s28, 2 }
 0x91a   : > { %s2414_s16 = sld [smem:[#allocation13_spill]] }
 0x91f   : > { %s1570_s22 = sand.u32 1, %s2413_s17  }
 0x920   : > { %p2415_p13 = scmp.ne.s32.totalorder %s2414_s16, 0  ;;  %s1571_s29 = scalar_lea.sflag [#allocation5], %s1570_s22 }
 0x922   : > { %p1805_p3 = pnand %p2416_p1, %p2415_p13 }
 0x924   : > { %p1806_p5 = pneg %p1805_p3 }
 0x926   : > { %1953 = dma.done.wait (%p1806_p5), %s1571_s29, 128  }
 0x927   : > { %1955 = vsyncadd (%p1806_p5), %s1571_s29, 4294967168  ;;  %s2417_s28 = sld [smem:[#allocation11_spill]]  ;;  %s2420_s25 = smov %s1962_s26 }
 0x928   : > { %s2418_s13 = sld [smem:[#allocation10_spill]] }
 0x929   : > { %s2419_s27 = sld [smem:[#allocation12_spill]] }
 0x92d   : > { %p26_p8 = scmp.ge.s32.totalorder %s2417_s28, 4  }
 0x92e   : > { %s2421_s26 = smov %s2418_s13 }
 0x92f   :  { %28 = sbr.rel (!%p26_p8) target bundleno = 7 (0x7), region = 117 }
 0x934   :  { %1576 = vsyncpa [#allocation4], 1 }
 0x935   :  { %1578 = vsyncpa [#allocation4 + $0x1], 1 }
 0x936   :  { %1579 = vsyncpa [#allocation5], 1 }
 0x937   :  { %1581 = vsyncpa [#allocation5 + $0x1], 1 }

// kernel: tpu_custom_call.1
= control target key start
LH: loop header
LB: loop body
LE: loop exit
PB: predicated region body
PF: predicated region fallthrough
CT: control target
= control target key end

     0   :  { %s2375_s0 = inlined_call_operand.hbm [shape: f32[2,8,32], index: 0, kind: input, shape index: {}]   ;;  %s2376_s1 = inlined_call_operand.vmem [shape: f32[32,96], index: 1, kind: input, shape index: {}]   ;;  %s2377_s2 = inlined_call_operand.vmem [shape: f32[1,96], index: 2, kind: input, shape index: {}]   ;;  %s2378_s3 = inlined_call_operand.vmem [shape: f32[32,32], index: 3, kind: input, shape index: {}]   ;;  %s2379_s4 = inlined_call_operand.vmem [shape: f32[1,32], index: 4, kind: input, shape index: {}]   ;;  %s2380_s5 = inlined_call_operand.vmem [shape: f32[32,64], index: 5, kind: input, shape index: {}]   ;;  %s2381_s6 = inlined_call_operand.vmem [shape: f32[1,64], index: 6, kind: input, shape index: {}]   ;;  %s2382_s7 = inlined_call_operand.vmem [shape: f32[64,32], index: 7, kind: input, shape index: {}]   ;;  %s2383_s8 = inlined_call_operand.vmem [shape: f32[1,32], index: 8, kind: input, shape index: {}]   ;;  %s2384_s9 = inlined_call_operand.vmem [shape: f32[1,32], index: 9, kind: input, shape index: {}]   ;;  %s2385_s10 = inlined_call_operand.vmem [shape: f32[1,32], index: 10, kind: input, shape index: {}]   ;;  %s2386_s11 = inlined_call_operand.vmem [shape: f32[1,32], index: 11, kind: input, shape index: {}]   ;;  %s2387_s12 = inlined_call_operand.vmem [shape: f32[1,32], index: 12, kind: input, shape index: {}]   ;;  %s2388_s13 = inlined_call_operand.hbm [shape: f32[2,8,32], index: 13, kind: output, shape index: {}]  }
   0x1   :  { %2397 = sst [smem:[#allocation14_spill]] %s2388_s13 }
   0x2   :  { %18 = vsyncpa [#allocation4], 0 }
   0x3   :  { %20 = vsyncpa [#allocation4 + $0x1], 0 }
   0x4   :  { %21 = vsyncpa [#allocation5], 0 }
   0x5   :  { %23 = vsyncpa [#allocation5 + $0x1], 0  ;;  %s2060_s25 = smov 0   ;;  %s2062_s26 = smov 0  }
   0x6   :  { %s2064_s27 = smov 0   ;;  %s2066_s28 = smov 0  }
   0x7 LB: > { %2398 = sst [smem:[#allocation9_spill]] %s1958_s25  ;;  %s2081_s29 = sadd.s32 4294967295, %s1970_s28   ;;  %s1970_s28 = sphi %s2066_s28, %s2417_s28   ;;  %s1966_s27 = sphi %s2064_s27, %s2419_s27   ;;  %s1962_s26 = sphi %s2062_s26, %s2421_s26   ;;  %s1958_s25 = sphi %s2060_s25, %s2420_s25  }
   0x8   : > { %2399 = sst [smem:[#allocation10_spill]] %s1966_s27  ;;  %s1628_s30 = sadd.s32 4294967294, %s1970_s28  }
   0x9   : > { %s2085_s14 = sadd.s32 1, %s1970_s28   ;;  %s36_s15 = sadd.s32 1, %s1966_s27 }
   0xa   : > { %2400 = sst [smem:[#allocation11_spill]] %s2085_s14  ;;  %s33_s16 = ssub.s32 %s1970_s28, %s2085_s14 }
   0xb   : > { %p43_p0 = scmp.ne.s32.totalorder %s1966_s27, %s1962_s26  ;;  %p34_p1 = scmp.eq.s32.totalorder %s33_s16, 0 }
   0xc   : > { %p44_p2 = scmp.eq.s32.totalorder %s1970_s28, 0  ;;  %p49_p3 = scmp.ne.s32.totalorder %s1962_s26, %s1958_s25 }
   0xd   : > { %p50_p4 = scmp.eq.s32.totalorder %s2081_s29, 0  ;;  %p325_p7 = scmp.eq.s32.totalorder %s2081_s29, 1 }
   0xe   : > { %s2097_s17 = scalar_select %p34_p1, %s1966_s27, %s36_s15  }
   0xf   : > { %p2099_p5 = por %p44_p2, %p43_p0  ;;  %p2103_p6 = por %p50_p4, %p49_p3 }
  0x10   : > { %2401 = sst [smem:[#allocation12_spill]] %s2097_s17  ;;  %p331_p8 = scmp.eq.s32.totalorder %s1628_s30, 1 }
  0x11   : > { %s2403_s19 = scalar_select %p2103_p6, 1, 0 }
  0x12   : > { %p1808_p10 = scmp.lt.s32.totalorder %s1970_s28, 2  ;;  %p2110_p11 = por %p325_p7, %p43_p0 }
  0x13   : > { %p2114_p12 = por %p331_p8, %p49_p3  ;;  %s387_s22 = sand.u32 1, %s1966_s27  }
  0x14   : > { %s2404_s20 = scalar_select %p2110_p11, 1, 0 }
  0x15   : > { %s2405_s21 = scalar_select %p2114_p12, 1, 0 }
  0x16   : > { %s1632_s23 = sshll.u32 %s1970_s28, 7  ;;  %s1631_s24 = sshll.u32 %s387_s22, 3 }
  0x17   : > { %2406 = sst [smem:[#allocation13_spill]] %s2405_s21  ;;  %s2123_s17 = scalar_lea.hbm %s2375_s0, %s1632_s23 }
  0x18   : > { %s391_s30 = scalar_lea.vmem [#allocation3], %s1631_s24  ;;  %p2127_p13 = pnand %p1808_p10, %p2099_p5 }
  0x19   : > { %s398_s14 = sshll.u32 %s391_s30, 4  ;;  %s388_s27 = scalar_lea.sflag [#allocation4], %s387_s22  ;;  %s2131_s14 = int_to_ptr.vmem [resolvable:$true] %s398_s14 }
  0x1a   : > { %s1878_s21 = scalar_lea.hbm %s2123_s17, 128  ;;  %p1880_p3 = pneg %p2127_p13 }
  0x1b   : > { %p1879_p2 = scmp.ne.s32.totalorder %s2123_s17, %s1878_s21  ;;  %s1883_s18 = scalar_lea.hbm %s2375_s0, 256 }
  0x1c   : > { %p1884_p5 = scmp.lt.s32.totalorder %s2123_s17, %s2375_s0  ;;  %p1885_p8 = scmp.lt.s32.totalorder %s1883_s18, %s1878_s21 }
  0x1d   : > { %p1881_p4 = pnand %p1880_p3, %p1879_p2 }
  0x1e   : > { %p1886_p10 = por %p1885_p8, %p1884_p5 }
  0x1f   : > { %p1882_p7 = pneg %p1881_p4 }
  0x21   : > { %p1887_p9 = pnand %p1886_p10, %p1882_p7 }
  0x23   : > { %1890 = shalt.err (!%p1887_p9)
}
  0x24   : > { %s1891_s22 = scalar_lea.vmem %s2131_s14, 128  ;;  %s1972_s30 = smov [#allocation3]  }
  0x25   : > { %p1892_p0 = scmp.ne.s32.totalorder %s2131_s14, %s1891_s22  ;;  %s1896_s13 = sshll.u32 %s1972_s30, 4  ;;  %s1897_s13 = int_to_ptr.vmem [resolvable:$false] %s1896_s13 }
  0x26   : > { %s1898_s23 = scalar_lea.vmem %s1897_s13, 256  ;;  %p1899_p4 = scmp.lt.s32.totalorder %s2131_s14, %s1897_s13 }
  0x27   : > { %p1894_p1 = pnand %p1892_p0, %p1880_p3  ;;  %p1900_p12 = scmp.lt.s32.totalorder %s1898_s23, %s1891_s22 }
  0x29   : > { %p1895_p2 = pneg %p1894_p1  ;;  %p1901_p11 = por %p1900_p12, %p1899_p4 }
  0x2b   : > { %p1902_p6 = pnand %p1901_p11, %p1895_p2 }
  0x2d   : > { %1905 = shalt.err (!%p1902_p6)
}
  0x2e   : > { %1803 = dma.hbm_to_vmem [thread:$0]  (!%p2127_p13), %s2123_s17, 128, %s2131_s14, %s388_s27  }
  0x2f   : > { %p2408_p9 = scmp.lt.s32.totalorder %s1970_s28, 3  ;;  %p2409_p7 = scmp.ge.s32.totalorder %s1970_s28, 1 }
  0x31   : > { %p404_p0 = pnand %p2409_p7, %p2408_p9 }
  0x32   : > { %s2158_s21 = sand.u32 (!%p404_p0), 1, %s1962_s26   ;;  %p2410_p6 = scmp.ne.s32.totalorder (!%p404_p0), %s2403_s19, 0 }
  0x33   : > { %407 = sbr.rel (%p404_p0) target bundleno = 2329 (0x919), region = 72  ;;  %s1634_s13 = sshll.u32 (!%p404_p0), %s2158_s21, 3 }
  0x34   : > { %s410_s24 = scalar_lea.sflag (!%p404_p0), [#allocation4], %s2158_s21  ;;  %s413_s25 = scalar_lea.vmem (!%p404_p0), [#allocation3], %s1634_s13 }
  0x38   : > { %1949 = dma.done.wait (%p2410_p6), %s410_s24, 128  }
  0x39   : > { %1951 = vsyncadd (%p2410_p6), %s410_s24, 4294967168  ;;  %v1973_v0 = vmov 0.0   ;;  %vm1974_vm0 = vmmov 0   ;;  %v460_v1 = vld [vmem:[%s2376_s1 + $0x18] sm:$0xff]  ;;  %v459_v2 = vld [vmem:[%s2376_s1 + $0x10] sm:$0xff]  ;;  %vm468_vm1 = vcmask 261120  }
  0x3a   : > { %1704 = vmatprep.subr.mxu1 %v1973_v0  ;;  %1712 = vmatprep.mubr.msk.f32.mxu1 %vm1974_vm0, %v1973_v0  ;;  %v458_v3 = vld [vmem:[%s2376_s1 + $0x8] sm:$0xff]  ;;  %v457_v4 = vld [vmem:[%s2376_s1] sm:$0xff]  ;;  %s1975_s24 = smov 120   ;;  %s1977_s27 = smov 80   ;;  %vm545_vm2 = vcmask 64512   ;;  %vm877_vm3 = vcmask 130112  }
  0x3b   : > { %1725 = vmatprep.subr.mxu0 %v1973_v0  ;;  %1727 = vmatprep.mubr.msk.f32.mxu0 %vm1974_vm0, %v1973_v0  ;;  %v2188_v5 = vld [vmem:[%s413_s25] sm:$0xff]  ;;  %v1636_v6 = vld [vmem:[%s2377_s2] ss:$0 sm:$0xff]  ;;  %s1976_s25 = smov 96   ;;  %s1978_s14 = smov 88   ;;  %vm1048_vm4 = vcmask 195712  }
  0x3c   : > { %1705 = vmatpush3.msra.mxu1 %v460_v1  ;;  %s1979_s17 = smov 72   ;;  %s1980_s18 = smov 112   ;;  %vm1219_vm5 = vcmask 261312   ;;  %vm1441_vm6 = vcmask 523264  }
  0x3d   : > { %1706 = vmatprep.subr.mxu1 %v1973_v0  ;;  %s1981_s19 = smov 104   ;;  %s1982_s15 = smov 56  }
  0x3e   : > { %1707 = vmatpush3.msra.mxu1 %v459_v2  ;;  %s1983_s16 = smov 64   ;;  %s1984_s22 = smov 40  }
  0x3f   : > { %1708 = vmatprep.subr.mxu1 %v1973_v0  ;;  %s1985_s30 = smov 48   ;;  %s1986_s23 = smov 8  }
  0x40   : > { %1709 = vmatpush3.msra.mxu1 %v458_v3  ;;  %p2412_p12 = scmp.ne.s32.totalorder %s2404_s20, 0 }
  0x41   : > { %1710 = vmatprep.subr.mxu1 %v1973_v0 }
  0x42   : > { %1711 = vmatpush3.msra.mxu1 %v457_v4 }
  0x43   : > { %1713 = vmatmul.mubr.msk.f32.vlgmr.msra.gmra.mxu1 %vm468_vm1, %v2188_v5  ;;  %1715 = vmatprep.subr.mxu1 %v1973_v0 }
  0x44   : > { %1717 = vmatprep.mubr.msk.f32.mxu1 %vm1974_vm0, %v1973_v0 }
 0x103   : > { %v538_v7 = vpop.f32.mrf.mxu1 }
 0x104   : > { %v539_v8 = vadd.f32 %v1636_v6, %v538_v7  ;;  %v1225_v7 = vld [vmem:[%s2378_s3 + $0x18] sm:$0xff] }
 0x105   : > { %v1714_v9 = vpop.f32.mrf.mxu1 }
 0x106   : > { %708 = vrot.lane.b32.xlu1 %v539_v8, %s1975_s24  ;;  %543 = vrot.lane.b32.xlu0 %v539_v8, %s1976_s25  ;;  %s1987_s24 = smov 16   ;;  %v1223_v9 = vld [vmem:[%s2378_s3 + $0x8] sm:$0xff]  ;;  %s455_s25 = scalar_lea.vmem [#allocation6], %s1634_s13 }
 0x10a   : > { %881 = vrot.lane.b32.xlu1 %v539_v8, %s1977_s27  ;;  %710 = vrot.lane.b32.xlu0 %v539_v8, %s1978_s14  ;;  %s1558_s27 = sshll.u32 %s455_s25, 4  ;;  %s1559_s27 = int_to_ptr.vmem [resolvable:$true] %s1558_s27 }
 0x10e   : > { %1052 = vrot.lane.b32.xlu1 %v539_v8, %s1979_s17  ;;  %879 = vrot.lane.b32.xlu0 %v539_v8, %s1980_s18  ;;  %s2411_s18 = sld [smem:[#allocation14_spill]] }
 0x112   : > { %1050 = vrot.lane.b32.xlu0 %v539_v8, %s1981_s19 }
 0x178   : > { %v709_v10 = vpop.permute.xlu1 %708  ;;  %v544_v11 = vpop.permute.xlu0 %543 }
 0x179   : > { %1716 = vmatpush3.xpose.msk.msra.mxu1 %vm545_vm2, %v544_v11 }
 0x17a   : > { %1720 = vmatprep.subr.mxu1 %v1973_v0 }
 0x17c   : > { %1718 = vmatmul.mubr.msk.f32.vlgmr.msra.gmra.mxu1 %vm545_vm2, %v539_v8  ;;  %v711_v12 = vpop.permute.xlu0 %710  ;;  %v882_v13 = vpop.permute.xlu1 %881 }
 0x17d   : > { %1726 = vmatpush3.xpose.msk.msra.mxu0 %vm545_vm2, %v711_v12  ;;  %1722 = vmatprep.mubr.msk.f32.mxu1 %vm1974_vm0, %v1973_v0 }
 0x17e   : > { %1735 = vmatprep.subr.mxu0 %v1973_v0 }
 0x180   : > { %1728 = vmatmul.mubr.msk.f32.vlgmr.msra.gmra.mxu0 %vm545_vm2, %v709_v10  ;;  %v880_v14 = vpop.permute.xlu0 %879  ;;  %v1053_v15 = vpop.permute.xlu1 %1052  ;;  %v1222_v10 = vld [vmem:[%s2378_s3] sm:$0xff] }
 0x181   : > { %1736 = vmatpush3.xpose.msk.msra.mxu0 %vm545_vm2, %v882_v13  ;;  %1737 = vmatprep.mubr.msk.f32.mxu0 %vm1974_vm0, %v1973_v0 }
 0x182   : > { %1745 = vmatprep.subr.mxu0 %v1973_v0 }
 0x184   : > { %1738 = vmatmul.mubr.msk.f32.vlgmr.msra.gmra.mxu0 %vm545_vm2, %v880_v14  ;;  %v1051_v16 = vpop.permute.xlu0 %1050 }
 0x185   : > { %1746 = vmatpush3.xpose.msk.msra.mxu0 %vm545_vm2, %v1053_v15  ;;  %1747 = vmatprep.mubr.msk.f32.mxu0 %vm1974_vm0, %v1973_v0 }
 0x186   : > { %1755 = vmatprep.subr.mxu0 %v1973_v0 }
 0x188   : > { %1748 = vmatmul.mubr.msk.f32.vlgmr.msra.gmra.mxu0 %vm545_vm2, %v1051_v16 }
 0x189   : > { %1763 = vmatprep.mubr.msk.f32.mxu0 %vm1974_vm0, %v1973_v0  ;;  %1756 = vmatpush3.msra.mxu0 %v1225_v7 }
 0x18a   : > { %1757 = vmatprep.subr.mxu0 %v1973_v0 }
 0x23c   : > { %v616_v17 = vpop.f32.mrf.mxu1 }
 0x23d   : > { %v620_v18 = vsel %vm545_vm2, %v616_v17, -inf }
 0x23e   : > { %621 = vmax.xlane.f32.xlu1 %v620_v18  ;;  %v1719_v19 = vpop.f32.mrf.mxu1 }
 0x23f   : > { %v1650_v19 = vld [vmem:[%s2379_s4] ss:$0 sm:$0xff] }
 0x240   : > { %v782_v20 = vpop.f32.mrf.mxu0 }
 0x241   : > { %v786_v21 = vsel %vm545_vm2, %v782_v20, -inf }
 0x242   : > { %787 = vmax.xlane.f32.xlu0 %v786_v21  ;;  %v1729_v22 = vpop.f32.mrf.mxu0 }
 0x244   : > { %v953_v23 = vpop.f32.mrf.mxu0 }
 0x245   : > { %v957_v24 = vsel %vm545_vm2, %v953_v23, -inf }
 0x246   : > { %958 = vmax.xlane.f32.xlu0 %v957_v24  ;;  %v1739_v25 = vpop.f32.mrf.mxu0 }
 0x248   : > { %v1124_v26 = vpop.f32.mrf.mxu0 }
 0x249   : > { %v1128_v28 = vsel %vm545_vm2, %v1124_v26, -inf }
 0x24a   : > { %v1749_v27 = vpop.f32.mrf.mxu0 }
 0x24f   : > { %795 = vrot.lane.b32.xlu1 %v539_v8, %s1982_s15  ;;  %s1545_s15 = scalar_lea.sflag [#allocation5], %s2158_s21 }
 0x25c   : > { %629 = vrot.lane.b32.xlu0 %v539_v8, %s1983_s16  ;;  %s1906_s16 = scalar_lea.vmem %s1559_s27, 128 }
 0x25d   : > { %p1907_p11 = scmp.ne.s32.totalorder %s1559_s27, %s1906_s16 }
 0x25f   : > { %p1908_p13 = pnand %p1907_p11, %p2412_p12 }
 0x260   : > { %1137 = vrot.lane.b32.xlu0 %v539_v8, %s1984_s22  ;;  %s1988_s22 = smov 24  }
 0x261   : > { %p1909_p1 = pneg %p1908_p13 }
 0x273   : > { %1129 = vmax.xlane.f32.xlu1 %v1128_v28 }
 0x284   : > { %966 = vrot.lane.b32.xlu1 %v539_v8, %s1985_s30  ;;  %v1224_v8 = vld [vmem:[%s2378_s3 + $0x10] sm:$0xff] }
 0x285   : > { %1758 = vmatpush3.msra.mxu0 %v1224_v8  ;;  %v1658_v8 = vld [vmem:[%s2386_s11] ss:$0 sm:$0xff] }
 0x286   : > { %1759 = vmatprep.subr.mxu0 %v1973_v0 }
 0x287   : > { %1760 = vmatpush3.msra.mxu0 %v1223_v9 }
 0x288   : > { %1761 = vmatprep.subr.mxu0 %v1973_v0 }
 0x289   : > { %1762 = vmatpush3.msra.mxu0 %v1222_v10  ;;  %v1659_v10 = vld [vmem:[%s2387_s12] ss:$0 sm:$0xff] }
 0x28a   : > { %1777 = vmatprep.subr.mxu0 %v1973_v0 }
 0x2c7   : > { %v622_v29 = vpop.xlane.xlu1 %621 }
 0x2c8   : > { %v623_v30 = vsub.f32 %v616_v17, %v622_v29 }
 0x2ca   : > { %v624_v31 = vmul.f32 1.442695, %v623_v30  ;;  %v1346_v30 = vld [vmem:[%s2380_s5 + $0x18] sm:$0xff] }
 0x2cb   : > { %v788_v32 = vpop.xlane.xlu0 %787  ;;  %v796_v40 = vpop.permute.xlu1 %795 }
 0x2cc   : > { %1858 = vpow2.f32 %v624_v31  ;;  %v789_v33 = vsub.f32 %v782_v20, %v788_v32  ;;  %v1345_v31 = vld [vmem:[%s2380_s5 + $0x10] sm:$0xff]  ;;  %v1343_v32 = vld [vmem:[%s2380_s5] sm:$0xff] }
 0x2ce   : > { %v790_v34 = vmul.f32 1.442695, %v789_v33  ;;  %v1434_v33 = vld [vmem:[%s2382_s7 + $0x38] sm:$0xff] }
 0x2cf   : > { %v959_v35 = vpop.xlane.xlu0 %958 }
 0x2d0   : > { %1860 = vpow2.f32 %v790_v34  ;;  %v960_v36 = vsub.f32 %v953_v23, %v959_v35  ;;  %v1433_v34 = vld [vmem:[%s2382_s7 + $0x30] sm:$0xff]  ;;  %v1432_v35 = vld [vmem:[%s2382_s7 + $0x28] sm:$0xff] }
 0x2d2   : > { %v961_v37 = vmul.f32 1.442695, %v960_v36  ;;  %v1431_v36 = vld [vmem:[%s2382_s7 + $0x20] sm:$0xff] }
 0x2d3   : > { %v630_v38 = vpop.permute.xlu0 %629 }
 0x2d4   : > { %1862 = vpow2.f32 %v961_v37  ;;  %1721 = vmatpush3.msra.mxu1 %v630_v38  ;;  %v1430_v37 = vld [vmem:[%s2382_s7 + $0x18] sm:$0xff] }
 0x2d5   : > { %1730 = vmatprep.subr.mxu1 %v1973_v0 }
 0x2d7   : > { %v1138_v50 = vpop.permute.xlu0 %1137 }
 0x2d9   : > { %v1859_v39 = vpop.eup %1858 }
 0x2da   : > { %1723 = vmatmul.mubr.msk.f32.vlgmr.msra.gmra.mxu1 %vm545_vm2, %v1859_v39  ;;  %v626_v45 = vsel %vm545_vm2, %v1859_v39, 0.0 }
 0x2db   : > { %1731 = vmatpush3.msra.mxu1 %v796_v40  ;;  %1732 = vmatprep.mubr.msk.f32.mxu1 %vm1974_vm0, %v1973_v0 }
 0x2dc   : > { %1740 = vmatprep.subr.mxu1 %v1973_v0 }
 0x2dd   : > { %v1861_v41 = vpop.eup %1860 }
 0x2de   : > { %1733 = vmatmul.mubr.msk.f32.vlgmr.msra.gmra.mxu1 %vm545_vm2, %v1861_v41  ;;  %v792_v42 = vsel %vm545_vm2, %v1861_v41, 0.0 }
 0x2df   : > { %793 = vadd.xlane.f32.xlu1 %v792_v42  ;;  %1742 = vmatprep.mubr.msk.f32.mxu1 %vm1974_vm0, %v1973_v0  ;;  %v1652_v42 = vld [vmem:[%s2384_s9] ss:$0 sm:$0xff] }
 0x2e1   : > { %v1863_v43 = vpop.eup %1862 }
 0x2e2   : > { %v963_v44 = vsel %vm545_vm2, %v1863_v43, 0.0 }
 0x2e3   : > { %964 = vadd.xlane.f32.xlu0 %v963_v44  ;;  %627 = vadd.xlane.f32.xlu1 %v626_v45  ;;  %v1653_v44 = vld [vmem:[%s2385_s10] ss:$0 sm:$0xff] }
 0x2fc   : > { %v1130_v46 = vpop.xlane.xlu1 %1129 }
 0x2fd   : > { %v1131_v47 = vsub.f32 %v1124_v26, %v1130_v46 }
 0x2ff   : > { %v1132_v48 = vmul.f32 1.442695, %v1131_v47 }
 0x300   : > { %v967_v49 = vpop.permute.xlu1 %966 }
 0x301   : > { %1864 = vpow2.f32 %v1132_v48  ;;  %1741 = vmatpush3.msra.mxu1 %v967_v49  ;;  %v1429_v48 = vld [vmem:[%s2382_s7 + $0x10] sm:$0xff]  ;;  %v1428_v49 = vld [vmem:[%s2382_s7 + $0x8] sm:$0xff] }
 0x302   : > { %1743 = vmatmul.mubr.msk.f32.vlgmr.msra.gmra.mxu1 %vm545_vm2, %v1863_v43  ;;  %1750 = vmatprep.subr.mxu1 %v1973_v0 }
 0x303   : > { %1751 = vmatpush3.msra.mxu1 %v1138_v50  ;;  %1752 = vmatprep.mubr.msk.f32.mxu1 %vm1974_vm0, %v1973_v0  ;;  %v1427_v50 = vld [vmem:[%s2382_s7] sm:$0xff] }
 0x304   : > { %1766 = vmatprep.subr.mxu1 %v1973_v0 }
 0x30e   : > { %v1865_v51 = vpop.eup %1864 }
 0x30f   : > { %1753 = vmatmul.mubr.msk.f32.vlgmr.msra.gmra.mxu1 %vm545_vm2, %v1865_v51  ;;  %v1134_v52 = vsel %vm545_vm2, %v1865_v51, 0.0  ;;  %v1654_v51 = vld [vmem:[%s2381_s6] ss:$0 sm:$0xff] }
 0x310   : > { %1135 = vadd.xlane.f32.xlu0 %v1134_v52  ;;  %1774 = vmatprep.mubr.msk.f32.mxu1 %vm1974_vm0, %v1973_v0 }
 0x311   : > { %1767 = vmatpush3.msra.mxu1 %v1346_v30 }
 0x312   : > { %1768 = vmatprep.subr.mxu1 %v1973_v0 }
 0x313   : > { %1769 = vmatpush3.msra.mxu1 %v1345_v31 }
 0x314   : > { %1770 = vmatprep.subr.mxu1 %v1973_v0 }
 0x368   : > { %v794_v53 = vpop.xlane.xlu1 %793 }
 0x36c   : > { %v628_v54 = vpop.xlane.xlu1 %627  ;;  %v965_v63 = vpop.xlane.xlu0 %964 }
 0x36d   : > { %1866 = vrcp.f32 %v628_v54 }
 0x36e   : > { %1868 = vrcp.f32 %v794_v53 }
 0x36f   : > { %1870 = vrcp.f32 %v965_v63 }
 0x37a   : > { %v1867_v55 = vpop.eup %1866 }
 0x37b   : > { %v1869_v59 = vpop.eup %1868 }
 0x37c   : > { %v1871_v2 = vpop.eup %1870 }
 0x399   : > { %v1136_v1 = vpop.xlane.xlu0 %1135 }
 0x39a   : > { %v701_v56 = vpop.f32.mrf.mxu1  ;;  %1872 = vrcp.f32 %v1136_v1 }
 0x39b   : > { %v706_v57 = vmul.f32 %v1867_v55, %v701_v56  ;;  %v1656_v56 = vld [vmem:[%s2383_s8] ss:$0 sm:$0xff] }
 0x39c   : > { %v1724_v58 = vpop.f32.mrf.mxu1 }
 0x39d   : > { %707 = vst.msk [vmem:[#allocation2] sm:$0xff] %vm545_vm2, %v706_v57 }
 0x39e   : > { %v867_v60 = vpop.f32.mrf.mxu1 }
 0x39f   : > { %v872_v61 = vmul.f32 %v1869_v59, %v867_v60 }
 0x3a0   : > { %v1734_v62 = vpop.f32.mrf.mxu1 }
 0x3a1   : > { %874 = vrot.lane.b32.xlu0 %v872_v61, %s1986_s23 }
 0x3a7   : > { %v1873_v11 = vpop.eup %1872 }
 0x3c2   : > { %v1038_v3 = vpop.f32.mrf.mxu1 }
 0x3c3   : > { %v1043_v4 = vmul.f32 %v1871_v2, %v1038_v3 }
 0x3c4   : > { %v1744_v6 = vpop.f32.mrf.mxu1 }
 0x3c5   : > { %1045 = vrot.lane.b32.xlu1 %v1043_v4, %s1987_s24  ;;  %s1661_s24 = sshll.u32 %s2081_s29, 7 }
 0x3c6   : > { %s1556_s19 = scalar_lea.hbm %s2411_s18, %s1661_s24 }
 0x3cf   : > { %v1209_v12 = vpop.f32.mrf.mxu1 }
 0x3d0   : > { %v1214_v13 = vmul.f32 %v1873_v11, %v1209_v12 }
 0x3d1   : > { %v1754_v14 = vpop.f32.mrf.mxu1 }
 0x3d2   : > { %1216 = vrot.lane.b32.xlu1 %v1214_v13, %s1988_s22  ;;  %s1989_s22 = smov [#allocation6]  }
 0x3d3   : > { %s1910_s29 = sshll.u32 %s1989_s22, 4  ;;  %s1911_s29 = int_to_ptr.vmem [resolvable:$false] %s1910_s29 }
 0x3d4   : > { %s1912_s13 = scalar_lea.vmem %s1911_s29, 256  ;;  %p1913_p3 = scmp.lt.s32.totalorder %s1559_s27, %s1911_s29 }
 0x3d5   : > { %p1914_p5 = scmp.lt.s32.totalorder %s1912_s13, %s1906_s16 }
 0x3d7   : > { %p1915_p8 = por %p1914_p5, %p1913_p3 }
 0x3d9   : > { %p1916_p10 = pnand %p1915_p8, %p1909_p1 }
 0x413   : > { %v875_v15 = vpop.permute.xlu0 %874 }
 0x414   : > { %878 = vst.msk [vmem:[#allocation2] sm:$0xff] %vm877_vm3, %v875_v15 }
 0x437   : > { %v1046_v16 = vpop.permute.xlu1 %1045 }
 0x438   : > { %1049 = vst.msk [vmem:[#allocation2] sm:$0xff] %vm1048_vm4, %v1046_v16 }
 0x444   : > { %v1217_v17 = vpop.permute.xlu1 %1216 }
 0x445   : > { %1220 = vst.msk [vmem:[#allocation2] sm:$0xff] %vm1219_vm5, %v1217_v17 }
 0x44c   : > { %v1221_v18 = vld [vmem:[#allocation2] sm:$0xff] }
 0x44d   : > { %1764 = vmatmul.mubr.msk.f32.vlgmr.msra.gmra.mxu0 %vm468_vm1, %v1221_v18 }
 0x44e   : > { %1793 = vmatprep.mubr.msk.f32.mxu0 %vm1974_vm0, %v1973_v0  ;;  %1778 = vmatpush3.msra.mxu0 %v1434_v33 }
 0x44f   : > { %1779 = vmatprep.subr.mxu0 %v1973_v0 }
 0x450   : > { %1780 = vmatpush3.msra.mxu0 %v1433_v34 }
 0x451   : > { %1781 = vmatprep.subr.mxu0 %v1973_v0 }
 0x452   : > { %1782 = vmatpush3.msra.mxu0 %v1432_v35 }
 0x453   : > { %1783 = vmatprep.subr.mxu0 %v1973_v0 }
 0x454   : > { %1784 = vmatpush3.msra.mxu0 %v1431_v36 }
 0x455   : > { %1785 = vmatprep.subr.mxu0 %v1973_v0 }
 0x456   : > { %1786 = vmatpush3.msra.mxu0 %v1430_v37 }
 0x457   : > { %1787 = vmatprep.subr.mxu0 %v1973_v0 }
 0x458   : > { %1788 = vmatpush3.msra.mxu0 %v1429_v48 }
 0x459   : > { %1789 = vmatprep.subr.mxu0 %v1973_v0 }
 0x45a   : > { %1790 = vmatpush3.msra.mxu0 %v1428_v49 }
 0x45b   : > { %1791 = vmatprep.subr.mxu0 %v1973_v0 }
 0x45c   : > { %1792 = vmatpush3.msra.mxu0 %v1427_v50 }
 0x50d   : > { %v1302_v20 = vpop.f32.mrf.mxu0 }
 0x50e   : > { %v1303_v21 = vadd.f32 %v1650_v19, %v1302_v20 }
 0x50f   : > { %v1765_v22 = vpop.f32.mrf.mxu0 }
 0x510   : > { %v1306_v23 = vadd.f32 %v1303_v21, %v2188_v5  ;;  %v1344_v5 = vld [vmem:[%s2380_s5 + $0x8] sm:$0xff] }
 0x511   : > { %1771 = vmatpush3.msra.mxu1 %v1344_v5 }
 0x512   : > { %v1307_v24 = vsel %vm468_vm1, %v1306_v23, 0.0  ;;  %1772 = vmatprep.subr.mxu1 %v1973_v0 }
 0x513   : > { %1308 = vadd.xlane.f32.xlu0 %v1307_v24  ;;  %1773 = vmatpush3.msra.mxu1 %v1343_v32 }
 0x59c   : > { %v1309_v25 = vpop.xlane.xlu0 %1308 }
 0x59d   : > { %v1311_v26 = vmul.f32 0.03125, %v1309_v25 }
 0x59f   : > { %v1312_v27 = vsub.f32 %v1306_v23, %v1311_v26 }
 0x5a1   : > { %v1313_v28 = vmul.f32 %v1312_v27, %v1312_v27 }
 0x5a3   : > { %v1314_v29 = vsel %vm468_vm1, %v1313_v28, 0.0 }
 0x5a4   : > { %1315 = vadd.xlane.f32.xlu1 %v1314_v29 }
 0x62d   : > { %v1316_v38 = vpop.xlane.xlu1 %1315 }
 0x62e   : > { %v1317_v39 = vmul.f32 0.03125, %v1316_v38 }
 0x630   : > { %v1318_v40 = vadd.f32 1e-05, %v1317_v39 }
 0x632   : > { %1874 = vrsqrt.f32 %v1318_v40 }
 0x63f   : > { %v1875_v41 = vpop.eup %1874 }
 0x640   : > { %v1320_v43 = vmul.f32 %v1875_v41, %v1312_v27 }
 0x642   : > { %v1328_v45 = vmul.f32 %v1652_v42, %v1320_v43 }
 0x644   : > { %v1336_v46 = vadd.f32 %v1653_v44, %v1328_v45 }
 0x646   : > { %1337 = vst.msk [vmem:[#allocation2] sm:$0xff] %vm468_vm1, %v1336_v46 }
 0x64d   : > { %v1342_v47 = vld [vmem:[#allocation2] sm:$0xff] }
 0x64e   : > { %1775 = vmatmul.mubr.msk.f32.vlgmr.msra.gmra.mxu1 %vm468_vm1, %v1342_v47 }
 0x70e   : > { %v1422_v52 = vpop.f32.mrf.mxu1 }
 0x70f   : > { %v1423_v53 = vadd.f32 %v1654_v51, %v1422_v52 }
 0x710   : > { %v1776_v54 = vpop.f32.mrf.mxu1 }
 0x711   : > { %v1426_v55 = vmax.f32 %v1423_v53, 0.0 }
 0x713   : > { %1794 = vmatmul.mubr.msk.f32.vlgmr.msra.gmra.mxu0 %vm1441_vm6, %v1426_v55 }
 0x7d3   : > { %v1511_v57 = vpop.f32.mrf.mxu0 }
 0x7d4   : > { %v1512_v58 = vadd.f32 %v1656_v56, %v1511_v57 }
 0x7d5   : > { %v1795_v59 = vpop.f32.mrf.mxu0 }
 0x7d6   : > { %v1515_v60 = vadd.f32 %v1512_v58, %v1342_v47 }
 0x7d8   : > { %v1516_v0 = vsel %vm468_vm1, %v1515_v60, 0.0 }
 0x7d9   : > { %1517 = vadd.xlane.f32.xlu0 %v1516_v0 }
 0x862   : > { %v1518_v61 = vpop.xlane.xlu0 %1517 }
 0x863   : > { %v1519_v62 = vmul.f32 0.03125, %v1518_v61 }
 0x865   : > { %v1520_v63 = vsub.f32 %v1515_v60, %v1519_v62 }
 0x867   : > { %v1521_v1 = vmul.f32 %v1520_v63, %v1520_v63 }
 0x869   : > { %v1522_v2 = vsel %vm468_vm1, %v1521_v1, 0.0 }
 0x86a   : > { %1523 = vadd.xlane.f32.xlu0 %v1522_v2 }
 0x8f3   : > { %v1524_v3 = vpop.xlane.xlu0 %1523 }
 0x8f4   : > { %v1525_v4 = vmul.f32 0.03125, %v1524_v3 }
 0x8f6   : > { %v1526_v6 = vadd.f32 1e-05, %v1525_v4 }
 0x8f8   : > { %1876 = vrsqrt.f32 %v1526_v6 }
 0x905   : > { %v1877_v7 = vpop.eup %1876 }
 0x906   : > { %v1528_v9 = vmul.f32 %v1877_v7, %v1520_v63 }
 0x908   : > { %v1535_v11 = vmul.f32 %v1658_v8, %v1528_v9 }
 0x90a   : > { %v1542_v12 = vadd.f32 %v1659_v10, %v1535_v11 }
 0x90c   : > { %1543 = vst.msk [vmem:[%s455_s25] sm:$0xff] %vm468_vm1, %v1542_v12 }
 0x90d   : > { %1919 = shalt.err (!%p1916_p10)
}
 0x90e   : > { %s1920_s30 = scalar_lea.hbm %s1556_s19, 128  ;;  %s1924_s24 = scalar_lea.hbm %s2411_s18, 256 }
 0x90f   : > { %p1921_p2 = scmp.ne.s32.totalorder %s1556_s19, %s1920_s30  ;;  %p1925_p7 = scmp.lt.s32.totalorder %s1556_s19, %s2411_s18 }
 0x910   : > { %p1926_p0 = scmp.lt.s32.totalorder %s1924_s24, %s1920_s30 }
 0x911   : > { %p1922_p4 = pnand %p1921_p2, %p2412_p12 }
 0x912   : > { %p1927_p6 = por %p1926_p0, %p1925_p7 }
 0x913   : > { %p1923_p9 = pneg %p1922_p4 }
 0x915   : > { %p1928_p11 = pnand %p1927_p6, %p1923_p9 }
 0x917   : > { %1931 = shalt.err (!%p1928_p11)
}
 0x918   : > { %1798 = dma.vmem_to_hbm [thread:$0]  (%p2412_p12), %s1559_s27, 128, %s1556_s19, %s1545_s15  }
 0x919 PF: > { %s2413_s17 = sld [smem:[#allocation9_spill]]  ;;  %p2416_p1 = scmp.ge.s32.totalorder %s1970_s28, 2 }
 0x91a   : > { %s2414_s16 = sld [smem:[#allocation13_spill]] }
 0x91f   : > { %s1570_s22 = sand.u32 1, %s2413_s17  }
 0x920   : > { %p2415_p13 = scmp.ne.s32.totalorder %s2414_s16, 0  ;;  %s1571_s29 = scalar_lea.sflag [#allocation5], %s1570_s22 }
 0x922   : > { %p1805_p3 = pnand %p2416_p1, %p2415_p13 }
 0x924   : > { %p1806_p5 = pneg %p1805_p3 }
 0x926   : > { %1953 = dma.done.wait (%p1806_p5), %s1571_s29, 128  }
 0x927   : > { %1955 = vsyncadd (%p1806_p5), %s1571_s29, 4294967168  ;;  %s2417_s28 = sld [smem:[#allocation11_spill]]  ;;  %s2420_s25 = smov %s1962_s26 }
 0x928   : > { %s2418_s13 = sld [smem:[#allocation10_spill]] }
 0x929   : > { %s2419_s27 = sld [smem:[#allocation12_spill]] }
 0x92d   : > { %p26_p8 = scmp.ge.s32.totalorder %s2417_s28, 4  }
 0x92e   : > { %s2421_s26 = smov %s2418_s13 }
 0x92f   :  { %28 = sbr.rel (!%p26_p8) target bundleno = 7 (0x7), region = 117 }
 0x934   :  { %1576 = vsyncpa [#allocation4], 1 }
 0x935   :  { %1578 = vsyncpa [#allocation4 + $0x1], 1 }
 0x936   :  { %1579 = vsyncpa [#allocation5], 1 }
 0x937   :  { %1581 = vsyncpa [#allocation5 + $0x1], 1 }

</bundles_post_ra>
